<compile_context>
chip_gen: v7x
topology: tpu7x:2x2x1
jax: 0.10.0
libtpu: 0.0.40
codegen_flags: <defaults>
</compile_context>

<pallas_src>
from functools import partial

import numpy as np
import jax
import jax.numpy as jnp
from jax.experimental import pallas as pl
from jax.experimental.pallas import tpu as pltpu


# ---------------------------------------------------------------------------
# Fused kernel core: GroupNorm -> SiLU -> 3x3 SAME conv on one (1, H, W, Cin) block
# ---------------------------------------------------------------------------
def _gn_silu_conv_core(x_ref, gamma_ref, beta_ref, w_ref, b_ref, xpad_ref, *, eps, groups):
    """Returns the conv output (+ bias) as a (H*W, Cout) f32 value."""
    _, H, W, Cin = x_ref.shape
    Cout = w_ref.shape[2]
    cpg = Cin // groups

    x = x_ref[...].reshape(H * W, Cin).astype(jnp.float32)

    # ---- GroupNorm statistics (per-channel sums -> per-group) ----------------
    ch_sum = jnp.sum(x, axis=0, keepdims=True)        # (1, Cin)
    ch_sq = jnp.sum(x * x, axis=0, keepdims=True)     # (1, Cin)

    # One-hot channel<->group maps built in-kernel (no HBM inputs / extra DMAs).
    c_idx = jax.lax.broadcasted_iota(jnp.int32, (Cin, groups), 0)
    g_idx = jax.lax.broadcasted_iota(jnp.int32, (Cin, groups), 1)
    m = jnp.logical_and(c_idx >= g_idx * cpg,
                        c_idx < (g_idx + 1) * cpg).astype(jnp.float32)        # (Cin, G)
    gt_idx = jax.lax.broadcasted_iota(jnp.int32, (groups, Cin), 0)
    ct_idx = jax.lax.broadcasted_iota(jnp.int32, (groups, Cin), 1)
    mt = jnp.logical_and(ct_idx >= gt_idx * cpg,
                         ct_idx < (gt_idx + 1) * cpg).astype(jnp.float32)     # (G, Cin)

    cnt = jnp.float32(H * W * cpg)
    g_mean = jnp.dot(ch_sum, m, preferred_element_type=jnp.float32) / cnt     # (1, G)
    g_msq = jnp.dot(ch_sq, m, preferred_element_type=jnp.float32) / cnt       # (1, G)
    # E[x^2]-E[x]^2 can cancel slightly negative in f32 -> clamp before rsqrt.
    g_var = jnp.maximum(g_msq - g_mean * g_mean, 0.0)
    g_inv = jax.lax.rsqrt(g_var + eps)
    mean_c = jnp.dot(g_mean, mt, preferred_element_type=jnp.float32)          # (1, Cin)
    inv_c = jnp.dot(g_inv, mt, preferred_element_type=jnp.float32)            # (1, Cin)

    # Fold gamma/beta/mean/inv into a single per-channel scale & shift (1 FMA/elem).
    scale = inv_c * gamma_ref[...]
    shift = beta_ref[...] - mean_c * scale

    # ---- normalize + SiLU, written into the padded VMEM tile -----------------
    y = x * scale + shift
    act = y * jax.nn.sigmoid(y)                                               # SiLU

    # Zero only the 1-pixel halo; the interior is fully overwritten below.
    zrow = jnp.zeros((1, W + 2, Cin), jnp.float32)
    zcol = jnp.zeros((H + 2, 1, Cin), jnp.float32)
    xpad_ref[0:1, :, :] = zrow
    xpad_ref[H + 1:H + 2, :, :] = zrow
    xpad_ref[:, 0:1, :] = zcol
    xpad_ref[:, W + 1:W + 2, :] = zcol
    xpad_ref[1:H + 1, 1:W + 1, :] = act.reshape(H, W, Cin)

    # ---- 3x3 conv: 9 shifted matmuls, bf16 operands, f32 accumulation --------
    # TODO(synk): for Cin < 128 concatenate the 3 kw taps along channels so each dot
    #             contracts K = 3*Cin and fills more of the MXU systolic depth.
    acc = jnp.zeros((H * W, Cout), jnp.float32)
    for kh in range(3):
        for kw in range(3):
            patch = xpad_ref[kh:kh + H, kw:kw + W, :].reshape(H * W, Cin)
            acc = acc + jnp.dot(patch.astype(jnp.bfloat16), w_ref[kh * 3 + kw],
                                preferred_element_type=jnp.float32)
    return acc + b_ref[...].astype(jnp.float32)


# ---------------------------------------------------------------------------
# Kernels
# ---------------------------------------------------------------------------
def _gn_silu_conv_kernel(x_ref, gamma_ref, beta_ref, w_ref, b_ref, o_ref, xpad_ref,
                         *, eps, groups):
    acc = _gn_silu_conv_core(x_ref, gamma_ref, beta_ref, w_ref, b_ref, xpad_ref,
                             eps=eps, groups=groups)
    _, H, W, Cout = o_ref.shape
    o_ref[...] = acc.reshape(1, H, W, Cout).astype(o_ref.dtype)


def _gn_silu_conv_add_identity_kernel(x_ref, gamma_ref, beta_ref, w_ref, b_ref, res_ref,
                                      o_ref, xpad_ref, *, eps, groups):
    # Fused epilogue: out = conv(silu(gn(x))) + residual
    acc = _gn_silu_conv_core(x_ref, gamma_ref, beta_ref, w_ref, b_ref, xpad_ref,
                             eps=eps, groups=groups)
    _, H, W, Cout = o_ref.shape
    res = res_ref[...].reshape(H * W, Cout).astype(jnp.float32)
    o_ref[...] = (acc + res).reshape(1, H, W, Cout).astype(o_ref.dtype)


def _gn_silu_conv_add_conv1x1_kernel(x_ref, gamma_ref, beta_ref, w_ref, b_ref, res_ref,
                                     ws_ref, bs_ref, o_ref, xpad_ref, *, eps, groups):
    # Fused epilogue: out = conv(silu(gn(x))) + Conv1x1(residual)
    acc = _gn_silu_conv_core(x_ref, gamma_ref, beta_ref, w_ref, b_ref, xpad_ref,
                             eps=eps, groups=groups)
    _, H, W, Cout = o_ref.shape
    Cres = res_ref.shape[3]
    res = res_ref[...].reshape(H * W, Cres)
    skip = jnp.dot(res.astype(jnp.bfloat16), ws_ref[...],
                   preferred_element_type=jnp.float32)
    out = acc + skip + bs_ref[...].astype(jnp.float32)
    o_ref[...] = out.reshape(1, H, W, Cout).astype(o_ref.dtype)


# ---------------------------------------------------------------------------
# Wrappers (pallas_call plumbing)
# ---------------------------------------------------------------------------
def _compiler_params():
    return pltpu.CompilerParams(
        dimension_semantics=("parallel",),        # batch axis -> both v7x TensorCores
        vmem_limit_bytes=64 * 1024 * 1024,
    )


def gn_silu_conv3x3(x, gamma, beta, w_taps, b, *, groups=32, eps=1e-5):
    """Fused GroupNorm -> SiLU -> Conv3x3(SAME).  x: (N, H, W, Cin) NHWC."""
    N, H, W, Cin = x.shape
    Cout = w_taps.shape[2]
    return pl.pallas_call(
        partial(_gn_silu_conv_kernel, eps=eps, groups=groups),
        out_shape=jax.ShapeDtypeStruct((N, H, W, Cout), x.dtype),
        grid=(N,),
        in_specs=[
            pl.BlockSpec((1, H, W, Cin), lambda n: (n, 0, 0, 0)),
            pl.BlockSpec((1, Cin), lambda n: (0, 0)),
            pl.BlockSpec((1, Cin), lambda n: (0, 0)),
            # constant block index -> weights stay resident in VMEM across grid steps
            pl.BlockSpec((9, Cin, Cout), lambda n: (0, 0, 0)),
            pl.BlockSpec((1, Cout), lambda n: (0, 0)),
        ],
        out_specs=pl.BlockSpec((1, H, W, Cout), lambda n: (n, 0, 0, 0)),
        scratch_shapes=[pltpu.VMEM((H + 2, W + 2, Cin), jnp.float32)],
        compiler_params=_compiler_params(),
    )(x, gamma.reshape(1, Cin), beta.reshape(1, Cin),
      w_taps.astype(jnp.bfloat16), b.reshape(1, Cout))


def gn_silu_conv3x3_skip_add(h, gamma, beta, w_taps, b, x_res, w_skip=None, b_skip=None,
                             *, groups=32, eps=1e-5):
    """Fused GroupNorm -> SiLU -> Conv3x3(SAME) -> (+ x_res) or (+ Conv1x1(x_res))."""
    N, H, W, Cin = h.shape
    Cout = w_taps.shape[2]
    Cres = x_res.shape[3]
    inputs = [h, gamma.reshape(1, Cin), beta.reshape(1, Cin),
              w_taps.astype(jnp.bfloat16), b.reshape(1, Cout), x_res]
    specs = [
        pl.BlockSpec((1, H, W, Cin), lambda n: (n, 0, 0, 0)),
        pl.BlockSpec((1, Cin), lambda n: (0, 0)),
        pl.BlockSpec((1, Cin), lambda n: (0, 0)),
        pl.BlockSpec((9, Cin, Cout), lambda n: (0, 0, 0)),
        pl.BlockSpec((1, Cout), lambda n: (0, 0)),
        pl.BlockSpec((1, H, W, Cres), lambda n: (n, 0, 0, 0)),
    ]
    if w_skip is None:
        kernel = partial(_gn_silu_conv_add_identity_kernel, eps=eps, groups=groups)
    else:
        kernel = partial(_gn_silu_conv_add_conv1x1_kernel, eps=eps, groups=groups)
        inputs += [w_skip.astype(jnp.bfloat16), b_skip.reshape(1, Cout)]
        specs += [pl.BlockSpec((Cres, Cout), lambda n: (0, 0)),
                  pl.BlockSpec((1, Cout), lambda n: (0, 0))]
    return pl.pallas_call(
        kernel,
        out_shape=jax.ShapeDtypeStruct((N, H, W, Cout), h.dtype),
        grid=(N,),
        in_specs=specs,
        out_specs=pl.BlockSpec((1, H, W, Cout), lambda n: (n, 0, 0, 0)),
        scratch_shapes=[pltpu.VMEM((H + 2, W + 2, Cin), jnp.float32)],
        compiler_params=_compiler_params(),
    )(*inputs)


# ---------------------------------------------------------------------------
# RB forward (NCHW in / NCHW out, matching the PyTorch module)
# ---------------------------------------------------------------------------
def rb_forward(x_nchw, params, *, groups=32, eps=1e-5):
    x = jnp.transpose(x_nchw, (0, 2, 3, 1))                      # NCHW -> NHWC
    h = gn_silu_conv3x3(x, params["gn1_g"], params["gn1_b"],
                        params["w1"], params["b1"], groups=groups, eps=eps)
    out = gn_silu_conv3x3_skip_add(h, params["gn2_g"], params["gn2_b"],
                                   params["w2"], params["b2"], x,
                                   params.get("ws"), params.get("bs"),
                                   groups=groups, eps=eps)
    return jnp.transpose(out, (0, 3, 1, 2))                      # NHWC -> NCHW


# ---------------------------------------------------------------------------
# Pure-JAX reference (for verification)
# ---------------------------------------------------------------------------
def rb_reference(x_nchw, params, num_groups=32, eps=1e-5):
    x = jnp.transpose(x_nchw, (0, 2, 3, 1))

    def gn(v, g, b):
        N, H, W, C = v.shape
        vg = v.reshape(N, H, W, num_groups, C // num_groups)
        mean = vg.mean(axis=(1, 2, 4), keepdims=True)
        var = ((vg - mean) ** 2).mean(axis=(1, 2, 4), keepdims=True)
        vn = ((vg - mean) * jax.lax.rsqrt(var + eps)).reshape(N, H, W, C)
        return vn * g.reshape(1, 1, 1, C) + b.reshape(1, 1, 1, C)

    def silu(v):
        return v * jax.nn.sigmoid(v)

    def conv(v, w_taps, bias):
        Cin, Cout = w_taps.shape[1], w_taps.shape[2]
        w = w_taps.reshape(3, 3, Cin, Cout)
        y = jax.lax.conv_general_dilated(
            v, w, (1, 1), "SAME", dimension_numbers=("NHWC", "HWIO", "NHWC"))
        return y + bias.reshape(1, 1, 1, Cout)

    h = conv(silu(gn(x, params["gn1_g"], params["gn1_b"])), params["w1"], params["b1"])
    h = conv(silu(gn(h, params["gn2_g"], params["gn2_b"])), params["w2"], params["b2"])
    if x.shape[-1] == h.shape[-1]:
        out = h + x
    else:
        out = h + jnp.einsum("nhwc,cd->nhwd", x, params["ws"]) \
                + params["bs"].reshape(1, 1, 1, -1)
    return jnp.transpose(out, (0, 3, 1, 2))


def make_params(key, cin, cout):
    ks = jax.random.split(key, 12)
    p = {
        "gn1_g": 1.0 + 0.1 * jax.random.normal(ks[0], (cin,), jnp.float32),
        "gn1_b": 0.1 * jax.random.normal(ks[1], (cin,), jnp.float32),
        "w1": 0.05 * jax.random.normal(ks[2], (9, cin, cout), jnp.float32),
        "b1": 0.05 * jax.random.normal(ks[3], (cout,), jnp.float32),
        "gn2_g": 1.0 + 0.1 * jax.random.normal(ks[4], (cout,), jnp.float32),
        "gn2_b": 0.1 * jax.random.normal(ks[5], (cout,), jnp.float32),
        "w2": 0.05 * jax.random.normal(ks[6], (9, cout, cout), jnp.float32),
        "b2": 0.05 * jax.random.normal(ks[7], (cout,), jnp.float32),
    }
    if cin != cout:
        p["ws"] = 0.05 * jax.random.normal(ks[8], (cin, cout), jnp.float32)
        p["bs"] = 0.05 * jax.random.normal(ks[9], (cout,), jnp.float32)
    return p


if __name__ == "__main__":
    key = jax.random.PRNGKey(0)
    N, H, W = 2, 8, 8

    # Case 1: in_channels != out_channels (skip is a fused 1x1 conv)
    cin, cout = 32, 64
    k0, k1 = jax.random.split(key)
    x = jax.random.normal(k0, (N, cin, H, W), jnp.float32)
    params = make_params(k1, cin, cout)
    out = rb_forward(x, params)
    jax.block_until_ready(out)
    ref = rb_reference(x, params)
    np.testing.assert_allclose(np.asarray(out), np.asarray(ref), atol=2e-2, rtol=2e-2)

    # Case 2: in_channels == out_channels (skip is a fused identity add)
    cin2 = cout2 = 32
    k2, k3 = jax.random.split(k1)
    x2 = jax.random.normal(k2, (N, cin2, H, W), jnp.float32)
    params2 = make_params(k3, cin2, cout2)
    out2 = rb_forward(x2, params2)
    jax.block_until_ready(out2)
    ref2 = rb_reference(x2, params2)
    np.testing.assert_allclose(np.asarray(out2), np.asarray(ref2), atol=2e-2, rtol=2e-2)

    print("KERNEL_OK")
</pallas_src>

<mosaic_0001>
module attributes {stable_mosaic.version = 11 : i64} {
  func.func @_gn_silu_conv_kernel(%arg0: i32, %arg1: memref<1x8x8x32xf32, #tpu.memory_space<vmem>>, %arg2: memref<1x32xf32, #tpu.memory_space<vmem>>, %arg3: memref<1x32xf32, #tpu.memory_space<vmem>>, %arg4: memref<9x32x64xbf16, #tpu.memory_space<vmem>>, %arg5: memref<1x64xf32, #tpu.memory_space<vmem>>, %arg6: memref<1x8x8x64xf32, #tpu.memory_space<vmem>>, %arg7: memref<10x10x32xf32, #tpu.memory_space<vmem>>) attributes {dimension_semantics = [#tpu.dimension_semantics<parallel>], iteration_bounds = array<i64: 2>, scalar_prefetch = 0 : i64, scratch_operands = 1 : i64, tpu.core_type = #tpu.core_type<tc>, window_params = [{transform_indices = @transform_0, window_bounds = array<i64: 1, 8, 8, 32>}, {pipeline_mode = #tpu.pipeline_mode<synchronous>, transform_indices = @transform_1, window_bounds = array<i64: 1, 32>}, {pipeline_mode = #tpu.pipeline_mode<synchronous>, transform_indices = @transform_2, window_bounds = array<i64: 1, 32>}, {pipeline_mode = #tpu.pipeline_mode<synchronous>, transform_indices = @transform_3, window_bounds = array<i64: 9, 32, 64>}, {pipeline_mode = #tpu.pipeline_mode<synchronous>, transform_indices = @transform_4, window_bounds = array<i64: 1, 64>}, {transform_indices = @transform_5, window_bounds = array<i64: 1, 8, 8, 64>}]} {
    %c0 = arith.constant 0 : index
    %c0_0 = arith.constant 0 : index
    %c0_1 = arith.constant 0 : index
    %c0_2 = arith.constant 0 : index
    %0 = vector.load %arg1[%c0, %c0_0, %c0_1, %c0_2] : memref<1x8x8x32xf32, #tpu.memory_space<vmem>>, vector<1x8x8x32xf32>
    %1 = vector.shape_cast %0 : vector<1x8x8x32xf32> to vector<64x32xf32>
    %cst = arith.constant dense<0.000000e+00> : vector<32xf32>
    %2 = vector.multi_reduction <add>, %1, %cst [0] : vector<64x32xf32> to vector<32xf32>
    %3 = vector.shape_cast %2 : vector<32xf32> to vector<1x32xf32>
    %4 = arith.mulf %1, %1 : vector<64x32xf32>
    %cst_3 = arith.constant dense<0.000000e+00> : vector<32xf32>
    %5 = vector.multi_reduction <add>, %4, %cst_3 [0] : vector<64x32xf32> to vector<32xf32>
    %6 = vector.shape_cast %5 : vector<32xf32> to vector<1x32xf32>
    %7 = tpu.iota {dimensions = array<i32: 0>} : vector<32x32xi32>
    %8 = tpu.iota {dimensions = array<i32: 1>} : vector<32x32xi32>
    %c1_i32 = arith.constant 1 : i32
    %9 = vector.broadcast %c1_i32 : i32 to vector<32x32xi32>
    %10 = arith.muli %8, %9 : vector<32x32xi32>
    %11 = arith.cmpi sge, %7, %10 : vector<32x32xi32>
    %c1_i32_4 = arith.constant 1 : i32
    %12 = vector.broadcast %c1_i32_4 : i32 to vector<32x32xi32>
    %13 = arith.addi %8, %12 : vector<32x32xi32>
    %c1_i32_5 = arith.constant 1 : i32
    %14 = vector.broadcast %c1_i32_5 : i32 to vector<32x32xi32>
    %15 = arith.muli %13, %14 : vector<32x32xi32>
    %16 = arith.cmpi slt, %7, %15 : vector<32x32xi32>
    %17 = arith.andi %11, %16 : vector<32x32xi1>
    %18 = arith.extui %17 : vector<32x32xi1> to vector<32x32xi32>
    %19 = arith.sitofp %18 : vector<32x32xi32> to vector<32x32xf32>
    %20 = tpu.iota {dimensions = array<i32: 0>} : vector<32x32xi32>
    %21 = tpu.iota {dimensions = array<i32: 1>} : vector<32x32xi32>
    %c1_i32_6 = arith.constant 1 : i32
    %22 = vector.broadcast %c1_i32_6 : i32 to vector<32x32xi32>
    %23 = arith.muli %20, %22 : vector<32x32xi32>
    %24 = arith.cmpi sge, %21, %23 : vector<32x32xi32>
    %c1_i32_7 = arith.constant 1 : i32
    %25 = vector.broadcast %c1_i32_7 : i32 to vector<32x32xi32>
    %26 = arith.addi %20, %25 : vector<32x32xi32>
    %c1_i32_8 = arith.constant 1 : i32
    %27 = vector.broadcast %c1_i32_8 : i32 to vector<32x32xi32>
    %28 = arith.muli %26, %27 : vector<32x32xi32>
    %29 = arith.cmpi slt, %21, %28 : vector<32x32xi32>
    %30 = arith.andi %24, %29 : vector<32x32xi1>
    %31 = arith.extui %30 : vector<32x32xi1> to vector<32x32xi32>
    %32 = arith.sitofp %31 : vector<32x32xi32> to vector<32x32xf32>
    %cst_9 = arith.constant dense<0.000000e+00> : vector<1x32xf32>
    %33 = tpu.matmul %3, %19, %cst_9 {dimension_numbers = #tpu.dot_dimension_numbers<[1], [0], [0], [1], [0, 0, 1, 1], [], []>} : vector<1x32xf32>, vector<32x32xf32>, vector<1x32xf32> -> vector<1x32xf32>
    %cst_10 = arith.constant 6.400000e+01 : f32
    %34 = vector.broadcast %cst_10 : f32 to vector<1x32xf32>
    %35 = arith.divf %33, %34 : vector<1x32xf32>
    %cst_11 = arith.constant dense<0.000000e+00> : vector<1x32xf32>
    %36 = tpu.matmul %6, %19, %cst_11 {dimension_numbers = #tpu.dot_dimension_numbers<[1], [0], [0], [1], [0, 0, 1, 1], [], []>} : vector<1x32xf32>, vector<32x32xf32>, vector<1x32xf32> -> vector<1x32xf32>
    %cst_12 = arith.constant 6.400000e+01 : f32
    %37 = vector.broadcast %cst_12 : f32 to vector<1x32xf32>
    %38 = arith.divf %36, %37 : vector<1x32xf32>
    %39 = arith.mulf %35, %35 : vector<1x32xf32>
    %40 = arith.subf %38, %39 : vector<1x32xf32>
    %cst_13 = arith.constant 0.000000e+00 : f32
    %41 = vector.broadcast %cst_13 : f32 to vector<1x32xf32>
    %42 = arith.maximumf %40, %41 : vector<1x32xf32>
    %cst_14 = arith.constant 9.99999974E-6 : f32
    %43 = vector.broadcast %cst_14 : f32 to vector<1x32xf32>
    %44 = arith.addf %42, %43 : vector<1x32xf32>
    %45 = math.rsqrt %44 : vector<1x32xf32>
    %cst_15 = arith.constant dense<0.000000e+00> : vector<1x32xf32>
    %46 = tpu.matmul %35, %32, %cst_15 {dimension_numbers = #tpu.dot_dimension_numbers<[1], [0], [0], [1], [0, 0, 1, 1], [], []>} : vector<1x32xf32>, vector<32x32xf32>, vector<1x32xf32> -> vector<1x32xf32>
    %cst_16 = arith.constant dense<0.000000e+00> : vector<1x32xf32>
    %47 = tpu.matmul %45, %32, %cst_16 {dimension_numbers = #tpu.dot_dimension_numbers<[1], [0], [0], [1], [0, 0, 1, 1], [], []>} : vector<1x32xf32>, vector<32x32xf32>, vector<1x32xf32> -> vector<1x32xf32>
    %c0_17 = arith.constant 0 : index
    %c0_18 = arith.constant 0 : index
    %48 = vector.load %arg2[%c0_17, %c0_18] : memref<1x32xf32, #tpu.memory_space<vmem>>, vector<1x32xf32>
    %49 = arith.mulf %47, %48 : vector<1x32xf32>
    %c0_19 = arith.constant 0 : index
    %c0_20 = arith.constant 0 : index
    %50 = vector.load %arg3[%c0_19, %c0_20] : memref<1x32xf32, #tpu.memory_space<vmem>>, vector<1x32xf32>
    %51 = arith.mulf %46, %49 : vector<1x32xf32>
    %52 = arith.subf %50, %51 : vector<1x32xf32>
    %53 = vector.broadcast %49 : vector<1x32xf32> to vector<64x32xf32>
    %54 = arith.mulf %1, %53 : vector<64x32xf32>
    %55 = vector.broadcast %52 : vector<1x32xf32> to vector<64x32xf32>
    %56 = arith.addf %54, %55 : vector<64x32xf32>
    %57 = arith.negf %56 : vector<64x32xf32>
    %58 = math.exp %57 : vector<64x32xf32>
    %cst_21 = arith.constant 1.000000e+00 : f32
    %59 = vector.broadcast %cst_21 : f32 to vector<64x32xf32>
    %60 = arith.addf %59, %58 : vector<64x32xf32>
    %61 = arith.divf %59, %60 : vector<64x32xf32>
    %62 = arith.mulf %56, %61 : vector<64x32xf32>
    %cst_22 = arith.constant 0.000000e+00 : f32
    %63 = vector.broadcast %cst_22 : f32 to vector<1x10x32xf32>
    %cst_23 = arith.constant 0.000000e+00 : f32
    %64 = vector.broadcast %cst_23 : f32 to vector<10x1x32xf32>
    %c0_24 = arith.constant 0 : index
    %c0_25 = arith.constant 0 : index
    %c0_26 = arith.constant 0 : index
    %65 = vector.load %arg7[%c0_24, %c0_25, %c0_26] : memref<10x10x32xf32, #tpu.memory_space<vmem>>, vector<1x10x32xf32>
    tpu.vector_store %arg7[%c0_24, %c0_25, %c0_26], %63 {strides = array<i32>} : memref<10x10x32xf32, #tpu.memory_space<vmem>>, vector<1x10x32xf32>,
    %c9 = arith.constant 9 : index
    %c0_27 = arith.constant 0 : index
    %c0_28 = arith.constant 0 : index
    %66 = vector.load %arg7[%c9, %c0_27, %c0_28] : memref<10x10x32xf32, #tpu.memory_space<vmem>>, vector<1x10x32xf32>
    tpu.vector_store %arg7[%c9, %c0_27, %c0_28], %63 {strides = array<i32>} : memref<10x10x32xf32, #tpu.memory_space<vmem>>, vector<1x10x32xf32>,
    %c0_29 = arith.constant 0 : index
    %c0_30 = arith.constant 0 : index
    %c0_31 = arith.constant 0 : index
    %67 = vector.load %arg7[%c0_29, %c0_30, %c0_31] : memref<10x10x32xf32, #tpu.memory_space<vmem>>, vector<10x1x32xf32>
    tpu.vector_store %arg7[%c0_29, %c0_30, %c0_31], %64 {strides = array<i32>} : memref<10x10x32xf32, #tpu.memory_space<vmem>>, vector<10x1x32xf32>,
    %c0_32 = arith.constant 0 : index
    %c9_33 = arith.constant 9 : index
    %c0_34 = arith.constant 0 : index
    %68 = vector.load %arg7[%c0_32, %c9_33, %c0_34] : memref<10x10x32xf32, #tpu.memory_space<vmem>>, vector<10x1x32xf32>
    tpu.vector_store %arg7[%c0_32, %c9_33, %c0_34], %64 {strides = array<i32>} : memref<10x10x32xf32, #tpu.memory_space<vmem>>, vector<10x1x32xf32>,
    %69 = vector.shape_cast %62 : vector<64x32xf32> to vector<8x8x32xf32>
    %c1 = arith.constant 1 : index
    %c1_35 = arith.constant 1 : index
    %c0_36 = arith.constant 0 : index
    %70 = vector.load %arg7[%c1, %c1_35, %c0_36] : memref<10x10x32xf32, #tpu.memory_space<vmem>>, vector<8x8x32xf32>
    tpu.vector_store %arg7[%c1, %c1_35, %c0_36], %69 {strides = array<i32>} : memref<10x10x32xf32, #tpu.memory_space<vmem>>, vector<8x8x32xf32>,
    %cst_37 = arith.constant 0.000000e+00 : f32
    %71 = vector.broadcast %cst_37 : f32 to vector<64x64xf32>
    %c0_38 = arith.constant 0 : index
    %c0_39 = arith.constant 0 : index
    %c0_40 = arith.constant 0 : index
    %72 = vector.load %arg7[%c0_38, %c0_39, %c0_40] : memref<10x10x32xf32, #tpu.memory_space<vmem>>, vector<8x8x32xf32>
    %73 = vector.shape_cast %72 : vector<8x8x32xf32> to vector<64x32xf32>
    %74 = arith.truncf %73 : vector<64x32xf32> to vector<64x32xbf16>
    %c0_41 = arith.constant 0 : index
    %c0_42 = arith.constant 0 : index
    %c0_43 = arith.constant 0 : index
    %75 = vector.load %arg4[%c0_41, %c0_42, %c0_43] : memref<9x32x64xbf16, #tpu.memory_space<vmem>>, vector<1x32x64xbf16>
    %76 = vector.shape_cast %75 : vector<1x32x64xbf16> to vector<32x64xbf16>
    %cst_44 = arith.constant dense<0.000000e+00> : vector<64x64xf32>
    %77 = tpu.matmul %74, %76, %cst_44 {dimension_numbers = #tpu.dot_dimension_numbers<[1], [0], [0], [1], [0, 0, 1, 1], [], []>} : vector<64x32xbf16>, vector<32x64xbf16>, vector<64x64xf32> -> vector<64x64xf32>
    %78 = arith.addf %71, %77 : vector<64x64xf32>
    %c0_45 = arith.constant 0 : index
    %c1_46 = arith.constant 1 : index
    %c0_47 = arith.constant 0 : index
    %79 = vector.load %arg7[%c0_45, %c1_46, %c0_47] : memref<10x10x32xf32, #tpu.memory_space<vmem>>, vector<8x8x32xf32>
    %80 = vector.shape_cast %79 : vector<8x8x32xf32> to vector<64x32xf32>
    %81 = arith.truncf %80 : vector<64x32xf32> to vector<64x32xbf16>
    %c1_48 = arith.constant 1 : index
    %c0_49 = arith.constant 0 : index
    %c0_50 = arith.constant 0 : index
    %82 = vector.load %arg4[%c1_48, %c0_49, %c0_50] : memref<9x32x64xbf16, #tpu.memory_space<vmem>>, vector<1x32x64xbf16>
    %83 = vector.shape_cast %82 : vector<1x32x64xbf16> to vector<32x64xbf16>
    %cst_51 = arith.constant dense<0.000000e+00> : vector<64x64xf32>
    %84 = tpu.matmul %81, %83, %cst_51 {dimension_numbers = #tpu.dot_dimension_numbers<[1], [0], [0], [1], [0, 0, 1, 1], [], []>} : vector<64x32xbf16>, vector<32x64xbf16>, vector<64x64xf32> -> vector<64x64xf32>
    %85 = arith.addf %78, %84 : vector<64x64xf32>
    %c0_52 = arith.constant 0 : index
    %c2 = arith.constant 2 : index
    %c0_53 = arith.constant 0 : index
    %86 = vector.load %arg7[%c0_52, %c2, %c0_53] : memref<10x10x32xf32, #tpu.memory_space<vmem>>, vector<8x8x32xf32>
    %87 = vector.shape_cast %86 : vector<8x8x32xf32> to vector<64x32xf32>
    %88 = arith.truncf %87 : vector<64x32xf32> to vector<64x32xbf16>
    %c2_54 = arith.constant 2 : index
    %c0_55 = arith.constant 0 : index
    %c0_56 = arith.constant 0 : index
    %89 = vector.load %arg4[%c2_54, %c0_55, %c0_56] : memref<9x32x64xbf16, #tpu.memory_space<vmem>>, vector<1x32x64xbf16>
    %90 = vector.shape_cast %89 : vector<1x32x64xbf16> to vector<32x64xbf16>
    %cst_57 = arith.constant dense<0.000000e+00> : vector<64x64xf32>
    %91 = tpu.matmul %88, %90, %cst_57 {dimension_numbers = #tpu.dot_dimension_numbers<[1], [0], [0], [1], [0, 0, 1, 1], [], []>} : vector<64x32xbf16>, vector<32x64xbf16>, vector<64x64xf32> -> vector<64x64xf32>
    %92 = arith.addf %85, %91 : vector<64x64xf32>
    %c1_58 = arith.constant 1 : index
    %c0_59 = arith.constant 0 : index
    %c0_60 = arith.constant 0 : index
    %93 = vector.load %arg7[%c1_58, %c0_59, %c0_60] : memref<10x10x32xf32, #tpu.memory_space<vmem>>, vector<8x8x32xf32>
    %94 = vector.shape_cast %93 : vector<8x8x32xf32> to vector<64x32xf32>
    %95 = arith.truncf %94 : vector<64x32xf32> to vector<64x32xbf16>
    %c3 = arith.constant 3 : index
    %c0_61 = arith.constant 0 : index
    %c0_62 = arith.constant 0 : index
    %96 = vector.load %arg4[%c3, %c0_61, %c0_62] : memref<9x32x64xbf16, #tpu.memory_space<vmem>>, vector<1x32x64xbf16>
    %97 = vector.shape_cast %96 : vector<1x32x64xbf16> to vector<32x64xbf16>
    %cst_63 = arith.constant dense<0.000000e+00> : vector<64x64xf32>
    %98 = tpu.matmul %95, %97, %cst_63 {dimension_numbers = #tpu.dot_dimension_numbers<[1], [0], [0], [1], [0, 0, 1, 1], [], []>} : vector<64x32xbf16>, vector<32x64xbf16>, vector<64x64xf32> -> vector<64x64xf32>
    %99 = arith.addf %92, %98 : vector<64x64xf32>
    %c1_64 = arith.constant 1 : index
    %c1_65 = arith.constant 1 : index
    %c0_66 = arith.constant 0 : index
    %100 = vector.load %arg7[%c1_64, %c1_65, %c0_66] : memref<10x10x32xf32, #tpu.memory_space<vmem>>, vector<8x8x32xf32>
    %101 = vector.shape_cast %100 : vector<8x8x32xf32> to vector<64x32xf32>
    %102 = arith.truncf %101 : vector<64x32xf32> to vector<64x32xbf16>
    %c4 = arith.constant 4 : index
    %c0_67 = arith.constant 0 : index
    %c0_68 = arith.constant 0 : index
    %103 = vector.load %arg4[%c4, %c0_67, %c0_68] : memref<9x32x64xbf16, #tpu.memory_space<vmem>>, vector<1x32x64xbf16>
    %104 = vector.shape_cast %103 : vector<1x32x64xbf16> to vector<32x64xbf16>
    %cst_69 = arith.constant dense<0.000000e+00> : vector<64x64xf32>
    %105 = tpu.matmul %102, %104, %cst_69 {dimension_numbers = #tpu.dot_dimension_numbers<[1], [0], [0], [1], [0, 0, 1, 1], [], []>} : vector<64x32xbf16>, vector<32x64xbf16>, vector<64x64xf32> -> vector<64x64xf32>
    %106 = arith.addf %99, %105 : vector<64x64xf32>
    %c1_70 = arith.constant 1 : index
    %c2_71 = arith.constant 2 : index
    %c0_72 = arith.constant 0 : index
    %107 = vector.load %arg7[%c1_70, %c2_71, %c0_72] : memref<10x10x32xf32, #tpu.memory_space<vmem>>, vector<8x8x32xf32>
    %108 = vector.shape_cast %107 : vector<8x8x32xf32> to vector<64x32xf32>
    %109 = arith.truncf %108 : vector<64x32xf32> to vector<64x32xbf16>
    %c5 = arith.constant 5 : index
    %c0_73 = arith.constant 0 : index
    %c0_74 = arith.constant 0 : index
    %110 = vector.load %arg4[%c5, %c0_73, %c0_74] : memref<9x32x64xbf16, #tpu.memory_space<vmem>>, vector<1x32x64xbf16>
    %111 = vector.shape_cast %110 : vector<1x32x64xbf16> to vector<32x64xbf16>
    %cst_75 = arith.constant dense<0.000000e+00> : vector<64x64xf32>
    %112 = tpu.matmul %109, %111, %cst_75 {dimension_numbers = #tpu.dot_dimension_numbers<[1], [0], [0], [1], [0, 0, 1, 1], [], []>} : vector<64x32xbf16>, vector<32x64xbf16>, vector<64x64xf32> -> vector<64x64xf32>
    %113 = arith.addf %106, %112 : vector<64x64xf32>
    %c2_76 = arith.constant 2 : index
    %c0_77 = arith.constant 0 : index
    %c0_78 = arith.constant 0 : index
    %114 = vector.load %arg7[%c2_76, %c0_77, %c0_78] : memref<10x10x32xf32, #tpu.memory_space<vmem>>, vector<8x8x32xf32>
    %115 = vector.shape_cast %114 : vector<8x8x32xf32> to vector<64x32xf32>
    %116 = arith.truncf %115 : vector<64x32xf32> to vector<64x32xbf16>
    %c6 = arith.constant 6 : index
    %c0_79 = arith.constant 0 : index
    %c0_80 = arith.constant 0 : index
    %117 = vector.load %arg4[%c6, %c0_79, %c0_80] : memref<9x32x64xbf16, #tpu.memory_space<vmem>>, vector<1x32x64xbf16>
    %118 = vector.shape_cast %117 : vector<1x32x64xbf16> to vector<32x64xbf16>
    %cst_81 = arith.constant dense<0.000000e+00> : vector<64x64xf32>
    %119 = tpu.matmul %116, %118, %cst_81 {dimension_numbers = #tpu.dot_dimension_numbers<[1], [0], [0], [1], [0, 0, 1, 1], [], []>} : vector<64x32xbf16>, vector<32x64xbf16>, vector<64x64xf32> -> vector<64x64xf32>
    %120 = arith.addf %113, %119 : vector<64x64xf32>
    %c2_82 = arith.constant 2 : index
    %c1_83 = arith.constant 1 : index
    %c0_84 = arith.constant 0 : index
    %121 = vector.load %arg7[%c2_82, %c1_83, %c0_84] : memref<10x10x32xf32, #tpu.memory_space<vmem>>, vector<8x8x32xf32>
    %122 = vector.shape_cast %121 : vector<8x8x32xf32> to vector<64x32xf32>
    %123 = arith.truncf %122 : vector<64x32xf32> to vector<64x32xbf16>
    %c7 = arith.constant 7 : index
    %c0_85 = arith.constant 0 : index
    %c0_86 = arith.constant 0 : index
    %124 = vector.load %arg4[%c7, %c0_85, %c0_86] : memref<9x32x64xbf16, #tpu.memory_space<vmem>>, vector<1x32x64xbf16>
    %125 = vector.shape_cast %124 : vector<1x32x64xbf16> to vector<32x64xbf16>
    %cst_87 = arith.constant dense<0.000000e+00> : vector<64x64xf32>
    %126 = tpu.matmul %123, %125, %cst_87 {dimension_numbers = #tpu.dot_dimension_numbers<[1], [0], [0], [1], [0, 0, 1, 1], [], []>} : vector<64x32xbf16>, vector<32x64xbf16>, vector<64x64xf32> -> vector<64x64xf32>
    %127 = arith.addf %120, %126 : vector<64x64xf32>
    %c2_88 = arith.constant 2 : index
    %c2_89 = arith.constant 2 : index
    %c0_90 = arith.constant 0 : index
    %128 = vector.load %arg7[%c2_88, %c2_89, %c0_90] : memref<10x10x32xf32, #tpu.memory_space<vmem>>, vector<8x8x32xf32>
    %129 = vector.shape_cast %128 : vector<8x8x32xf32> to vector<64x32xf32>
    %130 = arith.truncf %129 : vector<64x32xf32> to vector<64x32xbf16>
    %c8 = arith.constant 8 : index
    %c0_91 = arith.constant 0 : index
    %c0_92 = arith.constant 0 : index
    %131 = vector.load %arg4[%c8, %c0_91, %c0_92] : memref<9x32x64xbf16, #tpu.memory_space<vmem>>, vector<1x32x64xbf16>
    %132 = vector.shape_cast %131 : vector<1x32x64xbf16> to vector<32x64xbf16>
    %cst_93 = arith.constant dense<0.000000e+00> : vector<64x64xf32>
    %133 = tpu.matmul %130, %132, %cst_93 {dimension_numbers = #tpu.dot_dimension_numbers<[1], [0], [0], [1], [0, 0, 1, 1], [], []>} : vector<64x32xbf16>, vector<32x64xbf16>, vector<64x64xf32> -> vector<64x64xf32>
    %134 = arith.addf %127, %133 : vector<64x64xf32>
    %c0_94 = arith.constant 0 : index
    %c0_95 = arith.constant 0 : index
    %135 = vector.load %arg5[%c0_94, %c0_95] : memref<1x64xf32, #tpu.memory_space<vmem>>, vector<1x64xf32>
    %136 = vector.broadcast %135 : vector<1x64xf32> to vector<64x64xf32>
    %137 = arith.addf %134, %136 : vector<64x64xf32>
    %138 = vector.shape_cast %137 : vector<64x64xf32> to vector<1x8x8x64xf32>
    %c0_96 = arith.constant 0 : index
    %c0_97 = arith.constant 0 : index
    %c0_98 = arith.constant 0 : index
    %c0_99 = arith.constant 0 : index
    %139 = vector.load %arg6[%c0_96, %c0_97, %c0_98, %c0_99] : memref<1x8x8x64xf32, #tpu.memory_space<vmem>>, vector<1x8x8x64xf32>
    tpu.vector_store %arg6[%c0_96, %c0_97, %c0_98, %c0_99], %138 {strides = array<i32>} : memref<1x8x8x64xf32, #tpu.memory_space<vmem>>, vector<1x8x8x64xf32>,
    return
  }
  func.func @transform_0(%arg0: i32) -> (i32, i32, i32, i32) {
    %c0_i32 = arith.constant 0 : i32
    %c0_i32_0 = arith.constant 0 : i32
    %c0_i32_1 = arith.constant 0 : i32
    %c0_i32_2 = arith.constant 0 : i32
    return %arg0, %c0_i32, %c0_i32_0, %c0_i32_1 : i32, i32, i32, i32
  }
  func.func @transform_1(%arg0: i32) -> (i32, i32) {
    %c0_i32 = arith.constant 0 : i32
    %c0_i32_0 = arith.constant 0 : i32
    %c0_i32_1 = arith.constant 0 : i32
    return %c0_i32, %c0_i32_0 : i32, i32
  }
  func.func @transform_2(%arg0: i32) -> (i32, i32) {
    %c0_i32 = arith.constant 0 : i32
    %c0_i32_0 = arith.constant 0 : i32
    %c0_i32_1 = arith.constant 0 : i32
    return %c0_i32, %c0_i32_0 : i32, i32
  }
  func.func @transform_3(%arg0: i32) -> (i32, i32, i32) {
    %c0_i32 = arith.constant 0 : i32
    %c0_i32_0 = arith.constant 0 : i32
    %c0_i32_1 = arith.constant 0 : i32
    %c0_i32_2 = arith.constant 0 : i32
    return %c0_i32, %c0_i32_0, %c0_i32_1 : i32, i32, i32
  }
  func.func @transform_4(%arg0: i32) -> (i32, i32) {
    %c0_i32 = arith.constant 0 : i32
    %c0_i32_0 = arith.constant 0 : i32
    %c0_i32_1 = arith.constant 0 : i32
    return %c0_i32, %c0_i32_0 : i32, i32
  }
  func.func @transform_5(%arg0: i32) -> (i32, i32, i32, i32) {
    %c0_i32 = arith.constant 0 : i32
    %c0_i32_0 = arith.constant 0 : i32
    %c0_i32_1 = arith.constant 0 : i32
    %c0_i32_2 = arith.constant 0 : i32
    return %arg0, %c0_i32, %c0_i32_0, %c0_i32_1 : i32, i32, i32, i32
  }
}

</mosaic_0001>

<bundles_post_ra>
// kernel: tpu_custom_call.1
= control target key start
LH: loop header
LB: loop body
LE: loop exit
PB: predicated region body
PF: predicated region fallthrough
CT: control target
= control target key end

     0   :  { %10 = vsyncpa [#allocation4], 0  ;;  %s3474_s0 = inlined_call_operand.hbm [shape: f32[2,8,8,32], index: 0, kind: input, shape index: {}]   ;;  %s3475_s1 = inlined_call_operand.hbm [shape: f32[1,32], index: 1, kind: input, shape index: {}]   ;;  %s3476_s2 = inlined_call_operand.hbm [shape: f32[1,32], index: 2, kind: input, shape index: {}]   ;;  %s3477_s3 = inlined_call_operand.hbm [shape: bf16[9,32,64], index: 3, kind: input, shape index: {}]   ;;  %s3478_s4 = inlined_call_operand.hbm [shape: f32[1,64], index: 4, kind: input, shape index: {}]   ;;  %s3479_s5 = inlined_call_operand.hbm [shape: f32[2,8,8,64], index: 5, kind: output, shape index: {}]  }
   0x1   :  { %12 = vsyncpa [#allocation4 + $0x1], 0 }
   0x2   :  { %13 = vsyncpa [#allocation7], 0 }
   0x3   :  { %14 = vsyncpa [#allocation10], 0 }
   0x4   :  { %15 = vsyncpa [#allocation5], 0 }
   0x5   :  { %17 = vsyncpa [#allocation5 + $0x1], 0  ;;  %s2831_s18 = smov 0   ;;  %s2833_s19 = smov 0  }
   0x6   :  { %s2835_s20 = smov 0   ;;  %s2837_s21 = smov 0  }
   0x7 LB: > { %s2852_s22 = sadd.s32 4294967295, %s2783_s21   ;;  %s1989_s23 = sadd.s32 4294967294, %s2783_s21   ;;  %s2783_s21 = sphi %s2837_s21, %s3514_s21   ;;  %s2779_s20 = sphi %s2835_s20, %s3513_s20   ;;  %s2775_s19 = sphi %s2833_s19, %s3512_s19   ;;  %s2771_s18 = sphi %s2831_s18, %s3511_s18  }
   0x8   : > { %p43_p0 = scmp.ne.s32.totalorder %s2775_s19, %s2771_s18  ;;  %p3480_p1 = scmp.eq.s32.totalorder %s2852_s22, 0 }
   0x9   : > { %p157_p3 = scmp.eq.s32.totalorder %s1989_s23, 1  ;;  %p1990_p5 = scmp.ge.s32.totalorder %s2783_s21, 1 }
   0xa   : > { %p2861_p4 = por %p3480_p1, %p43_p0  ;;  %p164_p7 = scmp.lt.s32.totalorder %s2783_s21, 3 }
   0xb   : > { %p2866_p6 = por %p157_p3, %p43_p0  ;;  %s2785_s27 = smov [#allocation6]  }
   0xc   : > { %s3483_s24 = scalar_select %p2861_p4, 1, 0 }
   0xd   : > { %s3484_s25 = scalar_select %p2866_p6, 1, 0 }
   0xe   : > { %p2871_p8 = pnand %p1990_p5, %p164_p7  ;;  %s177_s28 = sshll.u32 %s2785_s27, 4  ;;  %s178_s28 = int_to_ptr.vmem [resolvable:$true] %s177_s28 }
   0xf   : > { %s2786_s29 = smov [#allocation9]   ;;  %s2787_s7 = smov [#allocation8]  }
  0x10   : > { %s3485_s26 = scalar_select %p2871_p8, 1, 0 }
  0x11   : > { %p2438_p10 = pneg %p2871_p8  ;;  %s198_s30 = sshll.u32 %s2786_s29, 4  ;;  %s2884_s30 = int_to_ptr.vmem [resolvable:$true] %s198_s30 }
  0x12   : > { %s2886_s8 = sshll.u32 %s2787_s7, 4  ;;  %s2567_s11 = scalar_lea.hbm %s3475_s1, 16  ;;  %s189_s8 = int_to_ptr.vmem [resolvable:$true] %s2886_s8 }
  0x13   : > { %p2880_p11 = pnand %p2438_p10, %p3480_p1  ;;  %p2568_p12 = scmp.ne.s32.totalorder %s3475_s1, %s2567_s11 }
  0x14   : > { %p2574_p5 = scmp.lt.u32.totalorder %s2567_s11, %s3475_s1 }
  0x15   : > { %p2896_p13 = pneg %p2880_p11 }
  0x17   : > { %p2570_p0 = pnand %p2896_p13, %p2568_p12 }
  0x19   : > { %p2571_p3 = pneg %p2570_p0 }
  0x1b   : > { %p2576_p7 = pnand %p2574_p5, %p2571_p3 }
  0x1d   : > { %2579 = shalt.err (!%p2576_p7)
}
  0x1e   : > { %s2580_s17 = scalar_lea.vmem %s178_s28, 16  ;;  %s2587_s23 = scalar_lea.vmem %s178_s28, 32 }
  0x1f   : > { %p2581_p10 = scmp.ne.s32.totalorder %s178_s28, %s2580_s17  ;;  %p2588_p2 = scmp.lt.s32.totalorder %s178_s28, %s178_s28 }
  0x20   : > { %p2589_p6 = scmp.lt.s32.totalorder %s2587_s23, %s2580_s17 }
  0x21   : > { %p2583_p9 = pnand %p2581_p10, %p2896_p13 }
  0x22   : > { %p2590_p4 = por %p2589_p6, %p2588_p2 }
  0x23   : > { %p2584_p1 = pneg %p2583_p9 }
  0x25   : > { %p2591_p8 = pnand %p2590_p4, %p2584_p1 }
  0x27   : > { %2594 = shalt.err (!%p2591_p8)
}
  0x28   : > { %2441 = dma.hbm_to_vmem [thread:$0]  (!%p2880_p11), %s3475_s1, 16, %s178_s28, [#allocation7]  }
  0x29   : > { %s2595_s10 = scalar_lea.hbm %s3477_s3, 2304 }
  0x2a   : > { %p2596_p9 = scmp.ne.s32.totalorder %s3477_s3, %s2595_s10  ;;  %p2602_p1 = scmp.lt.u32.totalorder %s2595_s10, %s3477_s3 }
  0x2c   : > { %p2598_p12 = pnand %p2596_p9, %p2896_p13 }
  0x2e   : > { %p2599_p2 = pneg %p2598_p12 }
  0x30   : > { %p2604_p4 = pnand %p2602_p1, %p2599_p2 }
  0x32   : > { %2607 = shalt.err (!%p2604_p4)
}
  0x33   : > { %s2608_s28 = scalar_lea.vmem %s2884_s30, 2304  ;;  %p2616_p3 = scmp.lt.s32.totalorder %s2884_s30, %s2884_s30 }
  0x34   : > { %p2609_p6 = scmp.ne.s32.totalorder %s2884_s30, %s2608_s28  ;;  %p2617_p5 = scmp.lt.s32.totalorder %s2608_s28, %s2608_s28 }
  0x36   : > { %p2611_p8 = pnand %p2609_p6, %p2896_p13  ;;  %p2618_p7 = por %p2617_p5, %p2616_p3 }
  0x38   : > { %p2612_p0 = pneg %p2611_p8 }
  0x3a   : > { %p2619_p10 = pnand %p2618_p7, %p2612_p0 }
  0x3c   : > { %2622 = shalt.err (!%p2619_p10)
}
  0x3d   : > { %s2788_s16 = smov 64   ;;  %s2789_s17 = smov 4  }
  0x3e   : > { %2447 = dma.hbm_to_vmem [thread:$0]  (!%p2880_p11), %s3477_s3, 2304, %s2884_s30, [#allocation10], %s2788_s16, %s2788_s16, %s2789_s17  }
  0x3f   : > { %s2623_s9 = scalar_lea.hbm %s3476_s2, 16 }
  0x40   : > { %p2624_p9 = scmp.ne.s32.totalorder %s3476_s2, %s2623_s9  ;;  %p2630_p1 = scmp.lt.u32.totalorder %s2623_s9, %s3476_s2 }
  0x42   : > { %p2626_p12 = pnand %p2624_p9, %p2896_p13 }
  0x44   : > { %p2627_p2 = pneg %p2626_p12 }
  0x46   : > { %p2632_p4 = pnand %p2630_p1, %p2627_p2 }
  0x48   : > { %2635 = shalt.err (!%p2632_p4)
}
  0x49   : > { %s2636_s15 = scalar_lea.vmem %s189_s8, 16  ;;  %s2643_s30 = scalar_lea.vmem %s189_s8, 32 }
  0x4a   : > { %p2637_p6 = scmp.ne.s32.totalorder %s189_s8, %s2636_s15  ;;  %p2644_p3 = scmp.lt.s32.totalorder %s189_s8, %s189_s8 }
  0x4b   : > { %p2645_p5 = scmp.lt.s32.totalorder %s2643_s30, %s2636_s15 }
  0x4c   : > { %p2639_p8 = pnand %p2637_p6, %p2896_p13 }
  0x4d   : > { %p2646_p7 = por %p2645_p5, %p2644_p3 }
  0x4e   : > { %p2640_p0 = pneg %p2639_p8 }
  0x50   : > { %p2647_p10 = pnand %p2646_p7, %p2640_p0 }
  0x52   : > { %2650 = shalt.err (!%p2647_p10)
}
  0x53   : > { %2444 = dma.hbm_to_vmem [thread:$0]  (!%p2880_p11), %s3476_s2, 16, %s189_s8, [#allocation7]  }
  0x54   : > { %s2790_s17 = smov [#allocation11]   ;;  %s2651_s7 = scalar_lea.hbm %s3478_s4, 16 }
  0x55   : > { %s212_s23 = sshll.u32 %s2790_s17, 4  ;;  %p2652_p9 = scmp.ne.s32.totalorder %s3478_s4, %s2651_s7  ;;  %s213_s23 = int_to_ptr.vmem [resolvable:$true] %s212_s23 }
  0x56   : > { %p2658_p1 = scmp.lt.u32.totalorder %s2651_s7, %s3478_s4 }
  0x57   : > { %p2654_p12 = pnand %p2652_p9, %p2896_p13 }
  0x59   : > { %p2655_p2 = pneg %p2654_p12 }
  0x5b   : > { %p2660_p4 = pnand %p2658_p1, %p2655_p2 }
  0x5d   : > { %2663 = shalt.err (!%p2660_p4)
}
  0x5e   : > { %s2664_s8 = scalar_lea.vmem %s213_s23, 16  ;;  %s2671_s13 = scalar_lea.vmem %s213_s23, 32 }
  0x5f   : > { %p2665_p6 = scmp.ne.s32.totalorder %s213_s23, %s2664_s8  ;;  %p2672_p3 = scmp.lt.s32.totalorder %s213_s23, %s213_s23 }
  0x60   : > { %p2673_p5 = scmp.lt.s32.totalorder %s2671_s13, %s2664_s8 }
  0x61   : > { %p2667_p8 = pnand %p2665_p6, %p2896_p13 }
  0x62   : > { %p2674_p7 = por %p2673_p5, %p2672_p3 }
  0x63   : > { %p2668_p0 = pneg %p2667_p8 }
  0x65   : > { %p2675_p10 = pnand %p2674_p7, %p2668_p0 }
  0x67   : > { %2678 = shalt.err (!%p2675_p10)
}
  0x68   : > { %2450 = dma.hbm_to_vmem [thread:$0]  (!%p2880_p11), %s3478_s4, 16, %s213_s23, [#allocation10]  }
  0x69   : > { %s2973_s14 = sadd.s32 1, %s2783_s21   ;;  %s30_s28 = sadd.s32 1, %s2779_s20 }
  0x6a   : > { %s27_s6 = ssub.s32 %s2783_s21, %s2973_s14  ;;  %p37_p13 = scmp.ne.s32.totalorder %s2779_s20, %s2775_s19 }
  0x6b   : > { %p28_p9 = scmp.eq.s32.totalorder %s27_s6, 0  ;;  %p38_p12 = scmp.eq.s32.totalorder %s2783_s21, 0 }
  0x6c   : > { %p3488_p2 = scmp.eq.s32.totalorder %s2852_s22, 1  ;;  %p2463_p4 = scmp.lt.s32.totalorder %s2783_s21, 2 }
  0x6d   : > { %s2989_s17 = scalar_select %p28_p9, %s2779_s20, %s30_s28  }
  0x6e   : > { %p2983_p1 = por %p3488_p2, %p37_p13  ;;  %p39_p6 = por %p38_p12, %p37_p13 }
  0x6f   : > { %s223_s27 = sand.u32 1, %s2779_s20   ;;  %s2102_s23 = sshll.u32 %s2783_s21, 10 }
  0x70   : > { %s1996_s29 = sshll.u32 %s223_s27, 6  ;;  %s2996_s10 = scalar_lea.hbm %s3474_s0, %s2102_s23 }
  0x71   : > { %s227_s11 = scalar_lea.vmem [#allocation3], %s1996_s29  ;;  %p3000_p11 = pnand %p2463_p4, %p39_p6 }
  0x72   : > { %s234_s12 = sshll.u32 %s227_s11, 4  ;;  %s3004_s13 = scalar_lea.sflag [#allocation4], %s223_s27  ;;  %s2998_s12 = int_to_ptr.vmem [resolvable:$true] %s234_s12 }
  0x73   : > { %s2679_s15 = scalar_lea.hbm %s2996_s10, 1024  ;;  %p2681_p0 = pneg %p3000_p11 }
  0x74   : > { %p2680_p8 = scmp.ne.s32.totalorder %s2996_s10, %s2679_s15  ;;  %s2684_s6 = scalar_lea.hbm %s3474_s0, 2048 }
  0x75   : > { %p2685_p7 = scmp.lt.u32.totalorder %s2996_s10, %s3474_s0  ;;  %p2686_p10 = scmp.lt.u32.totalorder %s2684_s6, %s2679_s15 }
  0x76   : > { %p2682_p3 = pnand %p2681_p0, %p2680_p8  ;;  %p2688_p9 = scmp.lt.u32.totalorder %s2679_s15, %s2996_s10 }
  0x77   : > { %p2687_p13 = por %p2686_p10, %p2685_p7 }
  0x78   : > { %p2683_p5 = pneg %p2682_p3 }
  0x79   : > { %p2689_p12 = por %p2688_p9, %p2687_p13 }
  0x7b   : > { %p2690_p2 = pnand %p2689_p12, %p2683_p5 }
  0x7d   : > { %2693 = shalt.err (!%p2690_p2)
}
  0x7e   : > { %s2694_s27 = scalar_lea.vmem %s2998_s12, 1024  ;;  %s2791_s7 = smov [#allocation3]  }
  0x7f   : > { %p2695_p4 = scmp.ne.s32.totalorder %s2998_s12, %s2694_s27  ;;  %s2699_s9 = sshll.u32 %s2791_s7, 4  ;;  %s2700_s9 = int_to_ptr.vmem [resolvable:$false] %s2699_s9 }
  0x80   : > { %s2701_s11 = scalar_lea.vmem %s2700_s9, 2048  ;;  %p2702_p3 = scmp.lt.s32.totalorder %s2998_s12, %s2700_s9 }
  0x81   : > { %p2697_p6 = pnand %p2695_p4, %p2681_p0  ;;  %p2703_p7 = scmp.lt.s32.totalorder %s2701_s11, %s2694_s27 }
  0x83   : > { %p2698_p8 = pneg %p2697_p6  ;;  %p2704_p10 = por %p2703_p7, %p2702_p3 }
  0x85   : > { %p2705_p13 = pnand %p2704_p10, %p2698_p8 }
  0x87   : > { %2708 = shalt.err (!%p2705_p13)
}
  0x88   : > { %s2792_s15 = smov 128   ;;  %s2793_s30 = smov 8  }
  0x89   : > { %2454 = dma.hbm_to_vmem [thread:$0]  (!%p3000_p11), %s2996_s10, 1024, %s2998_s12, %s3004_s13, %s2792_s15, %s2792_s15, %s2793_s30  }
  0x8a   : > { %p3491_p0 = scmp.ne.s32.totalorder %s3485_s26, 0 }
  0x8b   : > { %s3035_s28 = sand.u32 (!%p3491_p0), 1, %s2775_s19   ;;  %p3492_p5 = scmp.ne.s32.totalorder (!%p3491_p0), %s3483_s24, 0 }
  0x8c   : > { %246 = sbr.rel (%p3491_p0) target bundleno = 994 (0x3e2), region = 40  ;;  %s2000_s6 = sshll.u32 (!%p3491_p0), %s3035_s28, 6 }
  0x8d   : > { %s249_s29 = scalar_lea.sflag (!%p3491_p0), [#allocation4], %s3035_s28  ;;  %s3041_s23 = scalar_lea.vmem (!%p3491_p0), [#allocation3], %s2000_s6 }
  0x93   : > { %2754 = dma.done.wait (%p3492_p5), %s249_s29, 1024  }
  0x94   : > { %2756 = vsyncadd (%p3492_p5), %s249_s29, 4294966272  ;;  %p3493_p11 = scmp.eq.s32.totalorder %s2852_s22, 0 }
  0x96   : > { %2758 = dma.done.wait (%p3493_p11), [#allocation7], 32   ;;  %p3494_p9 = pmov %p3493_p11 }
  0x98   : > { %2760 = vsyncadd (%p3494_p9), [#allocation7], 4294967264  ;;  %p3495_p12 = pmov %p3494_p9 }
  0x99   : > { %p3496_p2 = pmov %p3494_p9 }
  0x9a   : > { %2762 = dma.done.wait (%p3495_p12), [#allocation10], 2320  }
  0x9b   : > { %2764 = vsyncadd (%p3496_p2), [#allocation10], 4294964976  ;;  %v355_v0 = vlaneseq  ;;  %v2794_v1 = vmov 0.0|0.0   ;;  %vm304_vm0 = vcmask 261120   ;;  %vm2795_vm1 = vmmov 0   ;;  %v3096_v10 = vld [vmem:[%s3041_s23] sm:$0xff] }
  0x9c   : > { %2330 = vmatprep.subr.bf16.mxu1 %v2794_v1  ;;  %2342 = vmatprep.subr.bf16.mxu0 %v2794_v1  ;;  %v2796_v4 = vmov 0.0   ;;  %v3099_v11 = vld [vmem:[%s3041_s23 + $0x8] sm:$0xff]  ;;  %v3106_v13 = vld [vmem:[%s3041_s23 + $0x10] sm:$0xff]  ;;  %v3109_v14 = vld [vmem:[%s3041_s23 + $0x18] sm:$0xff]  ;;  %v305_v15 = vsel %vm304_vm0, %v3096_v10, 0.0  ;;  %v326_v17 = vmul.f32 %v3096_v10, %v3096_v10  ;;  %s294_s24 = scalar_lea.vmem [#allocation12], %s2000_s6 }
  0x9d   : > { %v3057_v2 = vshrl.u32 %v355_v0, 7  ;;  %v3059_v3 = vand.u32 127, %v355_v0  ;;  %2186 = vmatprep.mubr.msk.f32.mxu1 %vm2795_vm1, %v2796_v4  ;;  %794 = vst.msk [vmem:[#allocation2] sm:$0xff] %vm304_vm0, %v2796_v4  ;;  %798 = vst.msk [vmem:[#allocation2 + $0x90] sm:$0xff] %vm304_vm0, %v2796_v4  ;;  %2208 = vmatprep.mubr.msk.f32.mxu0 %vm2795_vm1, %v2796_v4  ;;  %v306_v16 = vsel %vm304_vm0, %v3099_v11, 0.0  ;;  %v327_v18 = vmul.f32 %v3099_v11, %v3099_v11  ;;  %v3124_v19 = vld [vmem:[%s3041_s23 + $0x20] sm:$0xff] }
  0x9e   : > { %v307_v20 = vadd.f32 %v306_v16, %v305_v15  ;;  %v308_v21 = vsel %vm304_vm0, %v3106_v13, 0.0  ;;  %v328_v22 = vmul.f32 %v3106_v13, %v3106_v13  ;;  %v2797_v23 = vmov 1.0|1.0   ;;  %v3146_v25 = vld [vmem:[%s3041_s23 + $0x28] sm:$0xff]  ;;  %v3163_v29 = vld [vmem:[%s3041_s23 + $0x30] sm:$0xff]  ;;  %v3166_v30 = vld [vmem:[%s3041_s23 + $0x38] sm:$0xff] }
  0x9f   : > { %v3070_v5 = vadd.s32 8, %v3057_v2  ;;  %vm362_vm2 = vcmp.ge.s32.totalorder %v3057_v2, %v3059_v3  ;;  %v366_v6 = vadd.s32 1, %v3059_v3  ;;  %v3076_v7 = vadd.s32 16, %v3057_v2  ;;  %s2103_s26 = sshll.u32 %s2852_s22, 10  ;;  %s1878_s10 = sshll.u32 %s294_s24, 4  ;;  %s3427_s10 = int_to_ptr.vmem [resolvable:$true] %s1878_s10 }
  0xa0   : > { %v3079_v8 = vadd.s32 24, %v3057_v2  ;;  %v310_v26 = vsel %vm304_vm0, %v3109_v14, 0.0  ;;  %v329_v27 = vmul.f32 %v3109_v14, %v3109_v14  ;;  %v309_v31 = vadd.f32 %v308_v21, %v307_v20  ;;  %s3425_s13 = scalar_lea.hbm %s3479_s5, %s2103_s26  ;;  %s1865_s22 = scalar_lea.sflag [#allocation5], %s3035_s28 }
  0xa1   : > { %vm363_vm3 = vcmp.ge.s32.totalorder %v3070_v5, %v3059_v3  ;;  %vm367_vm4 = vcmp.lt.s32.totalorder %v3057_v2, %v366_v6  ;;  %vm368_vm5 = vcmp.lt.s32.totalorder %v3070_v5, %v366_v6  ;;  %vm364_vm7 = vcmp.ge.s32.totalorder %v3076_v7, %v3059_v3  ;;  %s2709_s27 = scalar_lea.vmem %s3427_s10, 1024  ;;  %s2798_s7 = smov [#allocation12]  }
  0xa2   : > { %vm3085_vm6 = vmand %vm362_vm2, %vm367_vm4  ;;  %vm365_vm8 = vcmp.ge.s32.totalorder %v3079_v8, %v3059_v3  ;;  %vm369_vm9 = vcmp.lt.s32.totalorder %v3076_v7, %v366_v6  ;;  %vm370_vm10 = vcmp.lt.s32.totalorder %v3079_v8, %v366_v6  ;;  %v312_v32 = vsel %vm304_vm0, %v3124_v19, 0.0  ;;  %p2710_p4 = scmp.ne.s32.totalorder %s3427_s10, %s2709_s27  ;;  %s2713_s9 = sshll.u32 %s2798_s7, 4  ;;  %s2714_s9 = int_to_ptr.vmem [resolvable:$false] %s2713_s9 }
  0xa3   : > { %vm3101_vm11 = vmand %vm363_vm3, %vm368_vm5  ;;  %vm383_vm15 = vcmp.ge.s32.totalorder %v3059_v3, %v3057_v2  ;;  %v387_v33 = vadd.s32 1, %v3057_v2  ;;  %v330_v34 = vmul.f32 %v3124_v19, %v3124_v19  ;;  %v334_v35 = vsel %vm304_vm0, %v326_v17, 0.0  ;;  %s2715_s11 = scalar_lea.vmem %s2714_s9, 2048  ;;  %p2716_p3 = scmp.lt.s32.totalorder %s3427_s10, %s2714_s9 }
  0xa4   : > { %vm2331_vm12 = vmpackc.low %vm3101_vm11, %vm3085_vm6  ;;  %v335_v36 = vsel %vm304_vm0, %v327_v18, 0.0  ;;  %vm384_vm3 = vcmp.ge.s32.totalorder %v3059_v3, %v3070_v5  ;;  %v311_v37 = vadd.f32 %v310_v26, %v309_v31  ;;  %v314_v38 = vsel %vm304_vm0, %v3146_v25, 0.0  ;;  %p2711_p6 = pnand %p2710_p4, %p2983_p1  ;;  %p2717_p7 = scmp.lt.s32.totalorder %s2715_s11, %s2709_s27 }
  0xa5   : > { %2332 = vmatpush3.bf16.msk.msra.mxu1 %vm2331_vm12, %v2797_v23  ;;  %vm3141_vm13 = vmand %vm364_vm7, %vm369_vm9  ;;  %v336_v39 = vadd.f32 %v335_v36, %v334_v35  ;;  %v337_v40 = vsel %vm304_vm0, %v328_v22, 0.0  ;;  %v331_v41 = vmul.f32 %v3146_v25, %v3146_v25  ;;  %v332_v42 = vmul.f32 %v3163_v29, %v3163_v29  ;;  %v2516_v36 = vld [vmem:[#allocation9 + $0x10] sm:$0xff]  }
  0xa6   : > { %2333 = vmatprep.subr.bf16.mxu1 %v2794_v1  ;;  %vm3158_vm14 = vmand %vm365_vm8, %vm370_vm10  ;;  %v333_v43 = vmul.f32 %v3166_v30, %v3166_v30  ;;  %v339_v44 = vsel %vm304_vm0, %v329_v27, 0.0  ;;  %v313_v45 = vadd.f32 %v312_v32, %v311_v37  ;;  %v388_v47 = vadd.s32 1, %v3070_v5  ;;  %v2517_v37 = vld [vmem:[#allocation9 + $0x48] sm:$0xff]   ;;  %p2712_p8 = pneg %p2711_p6  ;;  %p2718_p10 = por %p2717_p7, %p2716_p3 }
  0xa7   : > { %vm2334_vm2 = vmpackc.low %vm3158_vm14, %vm3141_vm13  ;;  %v338_v46 = vadd.f32 %v337_v40, %v336_v39  ;;  %vm391_vm4 = vcmp.lt.s32.totalorder %v3059_v3, %v387_v33  ;;  %v316_v48 = vsel %vm304_vm0, %v3163_v29, 0.0  ;;  %v341_v49 = vsel %vm304_vm0, %v330_v34, 0.0  ;;  %v3317_v39 = vld [vmem:[#allocation9 + $0x50] sm:$0xff]   ;;  %v3320_v40 = vld [vmem:[#allocation9] sm:$0xff]  }
  0xa8   : > { %vm3208_vm5 = vmand %vm383_vm15, %vm391_vm4  ;;  %v315_v51 = vadd.f32 %v314_v38, %v313_v45  ;;  %vm392_vm7 = vcmp.lt.s32.totalorder %v3059_v3, %v388_v47  ;;  %v318_v53 = vsel %vm304_vm0, %v3166_v30, 0.0  ;;  %v343_v54 = vsel %vm304_vm0, %v331_v41, 0.0  ;;  %v2518_v38 = vld [vmem:[#allocation9 + $0x18] sm:$0xff]   ;;  %p2719_p13 = pnand %p2718_p10, %p2712_p8 }
  0xa9   : > { %2335 = vmatpush3.bf16.msk.msra.mxu1 %vm2334_vm2, %v2797_v23  ;;  %v340_v52 = vadd.f32 %v339_v44, %v338_v46  ;;  %vm3219_vm8 = vmand %vm384_vm3, %vm392_vm7  ;;  %v345_v58 = vsel %vm304_vm0, %v332_v42, 0.0  ;;  %v347_v59 = vsel %vm304_vm0, %v333_v43, 0.0  ;;  %v389_v9 = vadd.s32 1, %v3076_v7  ;;  %v709_v47 = vld [vmem:[#allocation8] sm:$0x1] }
  0xaa   : > { %2336 = vmatprep.subr.bf16.mxu1 %v2794_v1  ;;  %v317_v56 = vadd.f32 %v316_v48, %v315_v51  ;;  %vm2343_vm9 = vmpackc.low %vm3219_vm8, %vm3208_vm5  ;;  %v390_v12 = vadd.s32 1, %v3079_v8  ;;  %vm385_vm6 = vcmp.ge.s32.totalorder %v3059_v3, %v3076_v7  ;;  %vm386_vm10 = vcmp.ge.s32.totalorder %v3059_v3, %v3079_v8 }
  0xab   : > { %v342_v57 = vadd.f32 %v341_v49, %v340_v52  ;;  %2344 = vmatpush3.bf16.msk.msra.mxu0 %vm2343_vm9, %v2797_v23  ;;  %vm393_vm11 = vcmp.lt.s32.totalorder %v3059_v3, %v389_v9  ;;  %v714_v43 = vsub.s32 0, %v3057_v2  ;;  %vm1855_vm3 = vcmask 523264  }
  0xac   : > { %v319_v60 = vadd.f32 %v318_v53, %v317_v56  ;;  %2345 = vmatprep.subr.bf16.mxu0 %v2794_v1  ;;  %vm397_vm13 = vmand %vm385_vm6, %vm393_vm11 }
  0xad   : > { %v344_v61 = vadd.f32 %v343_v54, %v342_v57 }
  0xae   : > { %v320_v62 = vrot.slane %v319_v60, 4 }
  0xaf   : > { %v346_v63 = vadd.f32 %v345_v58, %v344_v61 }
  0xb0   : > { %v321_v0 = vadd.f32 %v320_v62, %v319_v60 }
  0xb1   : > { %v348_v5 = vadd.f32 %v347_v59, %v346_v63 }
  0xb2   : > { %v322_v6 = vrot.slane %v321_v0, 2 }
  0xb3   : > { %v349_v15 = vrot.slane %v348_v5, 4 }
  0xb4   : > { %v323_v16 = vadd.f32 %v322_v6, %v321_v0 }
  0xb5   : > { %v350_v17 = vadd.f32 %v349_v15, %v348_v5 }
  0xb6   : > { %v324_v18 = vrot.slane %v323_v16, 1 }
  0xb7   : > { %v351_v20 = vrot.slane %v350_v17, 2 }
  0xb8   : > { %v325_v21 = vadd.f32 %v324_v18, %v323_v16 }
  0xb9   : > { %v352_v22 = vadd.f32 %v351_v20, %v350_v17 }
  0xba   : > { %2187 = vmatmul.mubr.msk.f32.vlgmr.msra.gmra.mrb[0].mxu1 %vm304_vm0, %v325_v21 }
  0xbb   : > { %v353_v26 = vrot.slane %v352_v22, 1  ;;  %2338 = vmatpush3.bf16.msk.msra.mxu1 %vm2331_vm12, %v2797_v23  ;;  %2197 = vmatprep.mubr.msk.f32.mxu1 %vm2795_vm1, %v2796_v4  ;;  %vm394_vm12 = vcmp.lt.s32.totalorder %v3059_v3, %v390_v12 }
  0xbc   : > { %2339 = vmatprep.subr.bf16.mxu1 %v2794_v1  ;;  %vm398_vm14 = vmand %vm386_vm10, %vm394_vm12 }
  0xbd   : > { %v354_v27 = vadd.f32 %v353_v26, %v352_v22  ;;  %vm2346_vm15 = vmpackc.low %vm398_vm14, %vm397_vm13 }
  0xbe   : > { %2347 = vmatpush3.bf16.msk.msra.mxu0 %vm2346_vm15, %v2797_v23 }
  0xbf   : > { %2341 = vmatpush3.bf16.msk.msra.mxu1 %vm2334_vm2, %v2797_v23  ;;  %vm800_vm2 = vcmask 253952  }
  0xc0   : > { %2348 = vmatprep.subr.bf16.mxu1 %v2794_v1  ;;  %801 = vst.msk [vmem:[#allocation2] sm:$0x1] %vm800_vm2, %v2796_v4  ;;  %802 = vst.msk [vmem:[#allocation2 + $0x10] sm:$0x1] %vm800_vm2, %v2796_v4 }
  0xc1   : > { %803 = vst.msk [vmem:[#allocation2 + $0x20] sm:$0x1] %vm800_vm2, %v2796_v4  ;;  %804 = vst.msk [vmem:[#allocation2 + $0x30] sm:$0x1] %vm800_vm2, %v2796_v4 }
  0xc2   : > { %2198 = vmatmul.mubr.msk.f32.vlgmr.msra.gmra.mrb[2].mxu1 %vm304_vm0, %v354_v27  ;;  %805 = vst.msk [vmem:[#allocation2 + $0x40] sm:$0x1] %vm800_vm2, %v2796_v4  ;;  %806 = vst.msk [vmem:[#allocation2 + $0x50] sm:$0x1] %vm800_vm2, %v2796_v4 }
  0xc3   : > { %2350 = vmatpush3.bf16.msk.msra.mxu1 %vm2343_vm9, %v2797_v23  ;;  %2219 = vmatprep.mubr.msk.f32.mxu1 %vm2795_vm1, %v2796_v4  ;;  %vm795_vm1 = vcmask 254976   ;;  %807 = vst.msk [vmem:[#allocation2 + $0x60] sm:$0x1] %vm800_vm2, %v2796_v4  ;;  %808 = vst.msk [vmem:[#allocation2 + $0x70] sm:$0x1] %vm800_vm2, %v2796_v4 }
  0xc4   : > { %2351 = vmatprep.subr.bf16.mxu1 %v2794_v1  ;;  %796 = vst.msk [vmem:[#allocation2 + $0x8] sm:$0x3] %vm795_vm1, %v2796_v4  ;;  %799 = vst.msk [vmem:[#allocation2 + $0x98] sm:$0x3] %vm795_vm1, %v2796_v4 }
  0xc5   : > { %809 = vst.msk [vmem:[#allocation2 + $0x80] sm:$0x1] %vm800_vm2, %v2796_v4  ;;  %810 = vst.msk [vmem:[#allocation2 + $0x90] sm:$0x1] %vm800_vm2, %v2796_v4 }
  0xc6   : > { %811 = vst.msk [vmem:[#allocation2 + $0x9] sm:$0x1] %vm800_vm2, %v2796_v4  ;;  %812 = vst.msk [vmem:[#allocation2 + $0x19] sm:$0x1] %vm800_vm2, %v2796_v4 }
  0xc7   : > { %2353 = vmatpush3.bf16.msk.msra.mxu1 %vm2346_vm15, %v2797_v23  ;;  %v2515_v23 = vld [vmem:[#allocation9 + $0x40] sm:$0xff]   ;;  %813 = vst.msk [vmem:[#allocation2 + $0x29] sm:$0x1] %vm800_vm2, %v2796_v4  ;;  %814 = vst.msk [vmem:[#allocation2 + $0x39] sm:$0x1] %vm800_vm2, %v2796_v4 }
  0xc8   : > { %815 = vst.msk [vmem:[#allocation2 + $0x49] sm:$0x1] %vm800_vm2, %v2796_v4  ;;  %816 = vst.msk [vmem:[#allocation2 + $0x59] sm:$0x1] %vm800_vm2, %v2796_v4  ;;  %2270 = vmatprep.subr.bf16.mxu0 %v2515_v23  ;;  %2222 = vmatprep.subr.bf16.mxu1 %v2516_v36 }
  0xc9   : > { %817 = vst.msk [vmem:[#allocation2 + $0x69] sm:$0x1] %vm800_vm2, %v2796_v4  ;;  %818 = vst.msk [vmem:[#allocation2 + $0x79] sm:$0x1] %vm800_vm2, %v2796_v4 }
  0xca   : > { %819 = vst.msk [vmem:[#allocation2 + $0x89] sm:$0x1] %vm800_vm2, %v2796_v4  ;;  %820 = vst.msk [vmem:[#allocation2 + $0x99] sm:$0x1] %vm800_vm2, %v2796_v4  ;;  %v707_v4 = vld [vmem:[#allocation6] sm:$0x1] }
 0x18d   : > { %v476_v1 = vpop.f32.mrb[0].mxu1 }
 0x18e   : > { %v481_v24 = vmul.f32 0.015625, %v476_v1  ;;  %v2188_v28 = vpop.f32.mrb[1].mxu1 }
 0x190   : > { %2209 = vmatmul.mubr.msk.f32.vlgmr.msra.gmra.mrb[0].mxu0 %vm304_vm0, %v481_v24  ;;  %v556_v31 = vmul.f32 %v481_v24, %v481_v24 }
 0x191   : > { %2271 = vmatpush3.bf16.msra.mxu0 %v2515_v23 }
 0x192   : > { %2272 = vmatprep.subr.bf16.mxu0 %v2517_v37 }
 0x195   : > { %v551_v7 = vpop.f32.mrb[2].mxu1  ;;  %2273 = vmatpush3.bf16.msra.mxu0 %v2517_v37 }
 0x196   : > { %v555_v32 = vmul.f32 0.015625, %v551_v7  ;;  %v2199_v8 = vpop.f32.mrb[3].mxu1  ;;  %2282 = vmatprep.subr.bf16.mxu0 %v3317_v39 }
 0x198   : > { %v557_v33 = vsub.f32 %v555_v32, %v556_v31 }
 0x19a   : > { %v558_v34 = vmax.f32 %v557_v33, 0.0 }
 0x19c   : > { %v559_v35 = vadd.f32 1e-05, %v558_v34 }
 0x19e   : > { %2533 = vrsqrt.f32 %v559_v35 }
 0x1a8   : > { %v2534_v3 = vpop.eup %2533 }
 0x1a9   : > { %2220 = vmatmul.mubr.msk.f32.vlgmr.msra.gmra.mrb[4].mxu1 %vm304_vm0, %v2534_v3 }
 0x1aa   : > { %2223 = vmatpush3.bf16.msra.mxu1 %v2516_v36 }
 0x1ab   : > { %2224 = vmatprep.subr.bf16.mxu1 %v2518_v38 }
 0x1ae   : > { %2225 = vmatpush3.bf16.msra.mxu1 %v2518_v38 }
 0x1af   : > { %2234 = vmatprep.subr.bf16.mxu1 %v3320_v40 }
 0x263   : > { %v630_v41 = vpop.f32.mrb[0].mxu0 }
 0x264   : > { %v2210_v42 = vpop.f32.mrb[1].mxu0 }
 0x27c   : > { %v703_v44 = vpop.f32.mrb[4].mxu1 }
 0x27d   : > { %v708_v45 = vmul.f32 %v707_v4, %v703_v44  ;;  %v2221_v46 = vpop.f32.mrb[5].mxu1 }
 0x27e   : > { %v846_v46 = vld [vmem:[#allocation2 + $0x1] sm:$0xff] }
 0x27f   : > { %v710_v48 = vmul.f32 %v708_v45, %v630_v41  ;;  %v715_v49 = vrot.slane %v708_v45, %v714_v43 }
 0x281   : > { %v711_v50 = vsub.f32 %v709_v47, %v710_v48  ;;  %v716_v51 = vmul.f32 %v715_v49, %v3096_v10  ;;  %v717_v52 = vmul.f32 %v715_v49, %v3099_v11  ;;  %v718_v53 = vmul.f32 %v715_v49, %v3106_v13 }
 0x282   : > { %v719_v54 = vmul.f32 %v715_v49, %v3109_v14  ;;  %v720_v56 = vmul.f32 %v715_v49, %v3124_v19  ;;  %v721_v2 = vmul.f32 %v715_v49, %v3146_v25  ;;  %v722_v57 = vmul.f32 %v715_v49, %v3163_v29 }
 0x283   : > { %v728_v55 = vrot.slane %v711_v50, %v714_v43  ;;  %v723_v58 = vmul.f32 %v715_v49, %v3166_v30 }
 0x285   : > { %v730_v59 = vadd.f32 %v728_v55, %v716_v51  ;;  %v731_v60 = vadd.f32 %v728_v55, %v717_v52  ;;  %v732_v61 = vadd.f32 %v728_v55, %v718_v53  ;;  %v733_v62 = vadd.f32 %v728_v55, %v719_v54 }
 0x286   : > { %v734_v10 = vadd.f32 %v728_v55, %v720_v56  ;;  %v735_v63 = vadd.f32 %v728_v55, %v721_v2  ;;  %v736_v11 = vadd.f32 %v728_v55, %v722_v57  ;;  %v737_v0 = vadd.f32 %v728_v55, %v723_v58  ;;  %v2520_v56 = vld [vmem:[#allocation9 + $0x58] sm:$0xff]   ;;  %v2522_v58 = vld [vmem:[#allocation9 + $0x8] sm:$0xff]  }
 0x287   : > { %v2034_v13 = vmul.f32 -1.442695, %v730_v59  ;;  %v2035_v5 = vmul.f32 -1.442695, %v731_v60  ;;  %v2036_v14 = vmul.f32 -1.442695, %v732_v61 }
 0x288   : > { %v2037_v6 = vmul.f32 -1.442695, %v733_v62  ;;  %v2038_v19 = vmul.f32 -1.442695, %v734_v10  ;;  %v2039_v25 = vmul.f32 -1.442695, %v735_v63 }
 0x289   : > { %2535 = vpow2.f32 %v2034_v13  ;;  %v2040_v29 = vmul.f32 -1.442695, %v736_v11  ;;  %v2041_v30 = vmul.f32 -1.442695, %v737_v0 }
 0x28a   : > { %2537 = vpow2.f32 %v2035_v5 }
 0x28b   : > { %2539 = vpow2.f32 %v2036_v14 }
 0x28c   : > { %2541 = vpow2.f32 %v2037_v6 }
 0x28d   : > { %2543 = vpow2.f32 %v2038_v19 }
 0x28e   : > { %2545 = vpow2.f32 %v2039_v25 }
 0x28f   : > { %2547 = vpow2.f32 %v2040_v29 }
 0x290   : > { %2549 = vpow2.f32 %v2041_v30 }
 0x293   : > { %v2536_v15 = vpop.eup %2535 }
 0x294   : > { %v2538_v16 = vpop.eup %2537  ;;  %v762_v17 = vadd.f32 1.0, %v2536_v15 }
 0x295   : > { %v2540_v18 = vpop.eup %2539  ;;  %v763_v20 = vadd.f32 1.0, %v2538_v16 }
 0x296   : > { %v2542_v21 = vpop.eup %2541  ;;  %v764_v22 = vadd.f32 1.0, %v2540_v18  ;;  %2551 = vrcp.f32 %v762_v17 }
 0x297   : > { %v2544_v26 = vpop.eup %2543  ;;  %v765_v27 = vadd.f32 1.0, %v2542_v21  ;;  %2553 = vrcp.f32 %v763_v20 }
 0x298   : > { %v2546_v9 = vpop.eup %2545  ;;  %v766_v12 = vadd.f32 1.0, %v2544_v26  ;;  %2555 = vrcp.f32 %v764_v22  ;;  %v2524_v22 = vld [vmem:[#allocation9 + $0x68] sm:$0xff]  }
 0x299   : > { %v2548_v1 = vpop.eup %2547  ;;  %v767_v24 = vadd.f32 1.0, %v2546_v9  ;;  %2557 = vrcp.f32 %v765_v27  ;;  %v2526_v27 = vld [vmem:[#allocation9 + $0x28] sm:$0xff]   ;;  %v1041_v9 = vld [vmem:[#allocation2 + $0x2] sm:$0xff] }
 0x29a   : > { %v2550_v28 = vpop.eup %2549  ;;  %v768_v7 = vadd.f32 1.0, %v2548_v1  ;;  %2559 = vrcp.f32 %v766_v12 }
 0x29b   : > { %v769_v31 = vadd.f32 1.0, %v2550_v28  ;;  %2561 = vrcp.f32 %v767_v24  ;;  %v2527_v24 = vld [vmem:[#allocation9 + $0x70] sm:$0xff]  }
 0x29c   : > { %2563 = vrcp.f32 %v768_v7 }
 0x29d   : > { %2565 = vrcp.f32 %v769_v31  ;;  %v2529_v31 = vld [vmem:[#allocation9 + $0x30] sm:$0xff]  }
 0x2a0   : > { %v2552_v32 = vpop.eup %2551 }
 0x2a1   : > { %v2554_v8 = vpop.eup %2553  ;;  %v786_v33 = vmul.f32 %v2552_v32, %v730_v59 }
 0x2a2   : > { %v2556_v34 = vpop.eup %2555  ;;  %v787_v35 = vmul.f32 %v2554_v8, %v731_v60  ;;  %v2525_v60 = vld [vmem:[#allocation9 + $0x20] sm:$0xff]  }
 0x2a3   : > { %v2558_v3 = vpop.eup %2557  ;;  %v788_v23 = vmul.f32 %v2556_v34, %v732_v61  ;;  %822 = vst.msk [vmem:[#allocation2 + $0x11] sm:$0xff] %vm304_vm0, %v786_v33 }
 0x2a4   : > { %v2560_v36 = vpop.eup %2559  ;;  %v789_v37 = vmul.f32 %v2558_v3, %v733_v62  ;;  %823 = vst.msk [vmem:[#allocation2 + $0x21] sm:$0xff] %vm304_vm0, %v787_v35  ;;  %v2523_v62 = vld [vmem:[#allocation9 + $0x60] sm:$0xff]   ;;  %v2528_v3 = vld [vmem:[#allocation9 + $0x78] sm:$0xff]  }
 0x2a5   : > { %v2562_v38 = vpop.eup %2561  ;;  %v790_v41 = vmul.f32 %v2560_v36, %v734_v10  ;;  %824 = vst.msk [vmem:[#allocation2 + $0x31] sm:$0xff] %vm304_vm0, %v788_v23  ;;  %v2530_v23 = vld [vmem:[#allocation9 + $0x38] sm:$0xff]   ;;  %v2531_v36 = vld [vmem:[#allocation9 + $0x80] sm:$0xff]  }
 0x2a6   : > { %v2564_v42 = vpop.eup %2563  ;;  %v791_v4 = vmul.f32 %v2562_v38, %v735_v63  ;;  %825 = vst.msk [vmem:[#allocation2 + $0x41] sm:$0xff] %vm304_vm0, %v789_v37  ;;  %v830_v63 = vld [vmem:[#allocation2] sm:$0xff]  ;;  %v1505_v38 = vld [vmem:[#allocation2 + $0x90] sm:$0xff] }
 0x2a7   : > { %v2566_v43 = vpop.eup %2565  ;;  %v792_v44 = vmul.f32 %v2564_v42, %v736_v11  ;;  %826 = vst.msk [vmem:[#allocation2 + $0x51] sm:$0xff] %vm304_vm0, %v790_v41 }
 0x2a8   : > { %v793_v45 = vmul.f32 %v2566_v43, %v737_v0  ;;  %827 = vst.msk [vmem:[#allocation2 + $0x61] sm:$0xff] %vm304_vm0, %v791_v4 }
 0x2a9   : > { %828 = vst.msk [vmem:[#allocation2 + $0x71] sm:$0xff] %vm304_vm0, %v792_v44 }
 0x2aa   : > { %829 = vst.msk [vmem:[#allocation2 + $0x81] sm:$0xff] %vm304_vm0, %v793_v45  ;;  %v847_v47 = vld [vmem:[#allocation2 + $0x11] sm:$0xff] }
 0x2ab   : > { %v854_v48 = vpack.c.bf16 %v847_v47, %v846_v46  ;;  %v1270_v49 = vld [vmem:[#allocation2 + $0x21] sm:$0xff]  ;;  %v3356_v11 = vld [vmem:[#allocation2 + $0x10] sm:$0xff] }
 0x2ac   : > { %v1277_v50 = vpack.c.bf16 %v1270_v49, %v847_v47  ;;  %v849_v51 = vld [vmem:[#allocation2 + $0x31] sm:$0xff]  ;;  %v1384_v13 = vld [vmem:[#allocation2 + $0x22] sm:$0xff]  ;;  %v838_v5 = vpack.c.bf16 %v3356_v11, %v830_v63 }
 0x2ad   : > { %2226 = vmatprep.mubr.msk.bf16.mxu1 %vm304_vm0, %v854_v48  ;;  %v3341_v52 = vpack.c.bf16 %v849_v51, %v1270_v49  ;;  %v1272_v53 = vld [vmem:[#allocation2 + $0x41] sm:$0xff]  ;;  %v1383_v0 = vld [vmem:[#allocation2 + $0x12] sm:$0xff] }
 0x2ae   : > { %2274 = vmatprep.mubr.msk.bf16.mxu0 %vm304_vm0, %v1277_v50  ;;  %v1278_v54 = vpack.c.bf16 %v1272_v53, %v849_v51  ;;  %v851_v55 = vld [vmem:[#allocation2 + $0x51] sm:$0xff]  ;;  %v1391_v14 = vpack.c.bf16 %v1384_v13, %v1383_v0  ;;  %v3367_v6 = vld [vmem:[#allocation2 + $0x20] sm:$0xff]  ;;  %v1049_v33 = vpack.c.bf16 %v1383_v0, %v1041_v9 }
 0x2af   : > { %2227 = vmatmul.mubr.msk.bf16.vlgmr.msra.gmra.mrb[8].mxu1 %vm304_vm0, %v3341_v52  ;;  %v3346_v2 = vpack.c.bf16 %v851_v55, %v1272_v53  ;;  %v1274_v57 = vld [vmem:[#allocation2 + $0x61] sm:$0xff]  ;;  %v3369_v19 = vld [vmem:[#allocation2 + $0x30] sm:$0xff]  ;;  %v1163_v4 = vpack.c.bf16 %v3367_v6, %v3356_v11 }
 0x2b0   : > { %2275 = vmatmul.mubr.msk.bf16.vlgmr.msra.gmra.mrb[4].mxu0 %vm304_vm0, %v1278_v54  ;;  %v1279_v59 = vpack.c.bf16 %v1274_v57, %v851_v55  ;;  %2235 = vmatpush3.bf16.msra.mxu1 %v3320_v40  ;;  %v853_v61 = vld [vmem:[#allocation2 + $0x71] sm:$0xff]  ;;  %v1386_v29 = vld [vmem:[#allocation2 + $0x42] sm:$0xff]  ;;  %v839_v18 = vpack.c.bf16 %v3369_v19, %v3367_v6 }
 0x2b1   : > { %2283 = vmatpush3.bf16.msra.mxu0 %v3317_v39  ;;  %2230 = vmatprep.mubr.msk.bf16.mxu1 %vm304_vm0, %v3346_v2  ;;  %v3354_v10 = vld [vmem:[#allocation2 + $0x81] sm:$0xff]  ;;  %v3358_v40 = vpack.c.bf16 %v853_v61, %v1274_v57  ;;  %v1385_v25 = vld [vmem:[#allocation2 + $0x32] sm:$0xff] }
 0x2b2   : > { %2278 = vmatprep.mubr.msk.bf16.mxu0 %vm304_vm0, %v1279_v59  ;;  %2284 = vmatprep.subr.bf16.mxu0 %v2520_v56  ;;  %v1280_v39 = vpack.c.bf16 %v3354_v10, %v853_v61  ;;  %v3371_v30 = vld [vmem:[#allocation2 + $0x40] sm:$0xff]  ;;  %v3373_v15 = vld [vmem:[#allocation2 + $0x50] sm:$0xff]  ;;  %v1392_v20 = vpack.c.bf16 %v1386_v29, %v1385_v25  ;;  %v1050_v34 = vpack.c.bf16 %v1385_v25, %v1384_v13 }
 0x2b3   : > { %2236 = vmatprep.subr.bf16.mxu1 %v2522_v58  ;;  %v1387_v16 = vld [vmem:[#allocation2 + $0x52] sm:$0xff]  ;;  %v1388_v17 = vld [vmem:[#allocation2 + $0x62] sm:$0xff]  ;;  %v840_v21 = vpack.c.bf16 %v3373_v15, %v3371_v30  ;;  %v1164_v43 = vpack.c.bf16 %v3371_v30, %v3369_v19 }
 0x2b4   : > { %2237 = vmatpush3.bf16.msra.mxu1 %v2522_v58  ;;  %v1393_v26 = vpack.c.bf16 %v1388_v17, %v1387_v16  ;;  %v836_v12 = vld [vmem:[#allocation2 + $0x60] sm:$0xff]  ;;  %v837_v1 = vld [vmem:[#allocation2 + $0x70] sm:$0xff]  ;;  %v1051_v35 = vpack.c.bf16 %v1387_v16, %v1386_v29 }
 0x2b5   : > { %2285 = vmatpush3.bf16.msra.mxu0 %v2520_v56  ;;  %2246 = vmatprep.subr.bf16.mxu1 %v2525_v60  ;;  %v1389_v28 = vld [vmem:[#allocation2 + $0x72] sm:$0xff]  ;;  %v1390_v7 = vld [vmem:[#allocation2 + $0x82] sm:$0xff]  ;;  %v841_v32 = vpack.c.bf16 %v837_v1, %v836_v12  ;;  %v1165_v44 = vpack.c.bf16 %v836_v12, %v3373_v15 }
 0x2b6   : > { %2294 = vmatprep.subr.bf16.mxu0 %v2523_v62  ;;  %v1394_v8 = vpack.c.bf16 %v1390_v7, %v1389_v28  ;;  %v1504_v37 = vld [vmem:[#allocation2 + $0x80] sm:$0xff]  ;;  %v1052_v41 = vpack.c.bf16 %v1389_v28, %v1388_v17  ;;  %v2532_v45 = vld [vmem:[#allocation9 + $0x88] sm:$0xff]   ;;  %v2096_v59 = vld [vmem:[#allocation11] ss:$0 sm:$0xff] }
 0x2b7   : > { %2231 = vmatmul.mubr.msk.bf16.gmra.mrb[12].mxu1 %vm304_vm0, %v3358_v40  ;;  %v1509_v42 = vpack.c.bf16 %v1505_v38, %v1504_v37  ;;  %v1619_v46 = vld [vmem:[#allocation2 + $0x91] sm:$0xff]  ;;  %v1166_v47 = vpack.c.bf16 %v1504_v37, %v837_v1 }
 0x2b8   : > { %2279 = vmatmul.mubr.msk.bf16.gmra.mrb[8].mxu0 %vm304_vm0, %v1280_v39  ;;  %2238 = vmatprep.mubr.msk.bf16.mxu1 %vm304_vm0, %v838_v5  ;;  %v1623_v48 = vpack.c.bf16 %v1619_v46, %v3354_v10  ;;  %v1733_v49 = vld [vmem:[#allocation2 + $0x92] sm:$0xff] }
 0x2b9   : > { %2286 = vmatprep.mubr.msk.bf16.mxu0 %vm304_vm0, %v1391_v14  ;;  %v1737_v50 = vpack.c.bf16 %v1733_v49, %v1390_v7 }
 0x2bf   : > { %2239 = vmatmul.mubr.msk.bf16.vlgmr.msra.gmra.mrb[8].mxu1 %vm304_vm0, %v839_v18 }
 0x2c0   : > { %2287 = vmatmul.mubr.msk.bf16.vlgmr.msra.gmra.mrb[4].mxu0 %vm304_vm0, %v1392_v20  ;;  %2242 = vmatprep.mubr.msk.bf16.mxu1 %vm304_vm0, %v840_v21 }
 0x2c1   : > { %2295 = vmatpush3.bf16.msra.mxu0 %v2523_v62  ;;  %2290 = vmatprep.mubr.msk.bf16.mxu0 %vm304_vm0, %v1393_v26 }
 0x2c2   : > { %2296 = vmatprep.subr.bf16.mxu0 %v2524_v22  ;;  %2247 = vmatpush3.bf16.msra.mxu1 %v2525_v60 }
 0x2c3   : > { %2248 = vmatprep.subr.bf16.mxu1 %v2526_v27 }
 0x2c5   : > { %2297 = vmatpush3.bf16.msra.mxu0 %v2524_v22 }
 0x2c6   : > { %2249 = vmatpush3.bf16.msra.mxu1 %v2526_v27  ;;  %2306 = vmatprep.subr.bf16.mxu0 %v2527_v24 }
 0x2c7   : > { %2243 = vmatmul.mubr.msk.bf16.gmra.mrb[12].mxu1 %vm304_vm0, %v841_v32  ;;  %2258 = vmatprep.subr.bf16.mxu1 %v2529_v31 }
 0x2c8   : > { %2291 = vmatmul.mubr.msk.bf16.gmra.mrb[8].mxu0 %vm304_vm0, %v1394_v8  ;;  %2250 = vmatprep.mubr.msk.bf16.mxu1 %vm304_vm0, %v1049_v33 }
 0x2c9   : > { %2298 = vmatprep.mubr.msk.bf16.mxu0 %vm304_vm0, %v839_v18 }
 0x2cf   : > { %2251 = vmatmul.mubr.msk.bf16.vlgmr.msra.gmra.mrb[8].mxu1 %vm304_vm0, %v1050_v34 }
 0x2d0   : > { %2299 = vmatmul.mubr.msk.bf16.vlgmr.msra.gmra.mrb[4].mxu0 %vm304_vm0, %v840_v21  ;;  %2254 = vmatprep.mubr.msk.bf16.mxu1 %vm304_vm0, %v1051_v35 }
 0x2d1   : > { %2307 = vmatpush3.bf16.msra.mxu0 %v2527_v24  ;;  %2302 = vmatprep.mubr.msk.bf16.mxu0 %vm304_vm0, %v841_v32 }
 0x2d2   : > { %2308 = vmatprep.subr.bf16.mxu0 %v2528_v3  ;;  %2259 = vmatpush3.bf16.msra.mxu1 %v2529_v31 }
 0x2d3   : > { %2260 = vmatprep.subr.bf16.mxu1 %v2530_v23 }
 0x2d5   : > { %2309 = vmatpush3.bf16.msra.mxu0 %v2528_v3 }
 0x2d6   : > { %2261 = vmatpush3.bf16.msra.mxu1 %v2530_v23  ;;  %2318 = vmatprep.subr.bf16.mxu0 %v2531_v36 }
 0x2d7   : > { %2255 = vmatmul.mubr.msk.bf16.gmra.mrb[12].mxu1 %vm304_vm0, %v1052_v41 }
 0x2d8   : > { %2303 = vmatmul.mubr.msk.bf16.gmra.mrb[8].mxu0 %vm304_vm0, %v1509_v42  ;;  %2262 = vmatprep.mubr.msk.bf16.mxu1 %vm304_vm0, %v1163_v4 }
 0x2d9   : > { %2310 = vmatprep.mubr.msk.bf16.mxu0 %vm304_vm0, %v3341_v52 }
 0x2df   : > { %2263 = vmatmul.mubr.msk.bf16.vlgmr.msra.gmra.mrb[8].mxu1 %vm304_vm0, %v1164_v43 }
 0x2e0   : > { %2311 = vmatmul.mubr.msk.bf16.vlgmr.msra.gmra.mrb[4].mxu0 %vm304_vm0, %v3346_v2  ;;  %2266 = vmatprep.mubr.msk.bf16.mxu1 %vm304_vm0, %v1165_v44 }
 0x2e1   : > { %2319 = vmatpush3.bf16.msra.mxu0 %v2531_v36  ;;  %2314 = vmatprep.mubr.msk.bf16.mxu0 %vm304_vm0, %v3358_v40 }
 0x2e2   : > { %2320 = vmatprep.subr.bf16.mxu0 %v2532_v45 }
 0x2e5   : > { %2321 = vmatpush3.bf16.msra.mxu0 %v2532_v45 }
 0x2e7   : > { %2267 = vmatmul.mubr.msk.bf16.gmra.mrb[12].mxu1 %vm304_vm0, %v1166_v47 }
 0x2e8   : > { %2315 = vmatmul.mubr.msk.bf16.gmra.mrb[8].mxu0 %vm304_vm0, %v1623_v48 }
 0x2e9   : > { %2322 = vmatprep.mubr.msk.bf16.mxu0 %vm304_vm0, %v1050_v34 }
 0x2f0   : > { %2323 = vmatmul.mubr.msk.bf16.vlgmr.msra.gmra.mrb[4].mxu0 %vm304_vm0, %v1051_v35 }
 0x2f1   : > { %2326 = vmatprep.mubr.msk.bf16.mxu0 %vm304_vm0, %v1052_v41 }
 0x2f8   : > { %2327 = vmatmul.mubr.msk.bf16.gmra.mrb[8].mxu0 %vm304_vm0, %v1737_v50 }
 0x3b2   : > { %v2264_v51 = vpop.f32.mrb[8].mxu1 }
 0x3b3   : > { %v1230_v52 = vpop.f32.mrb[9].mxu1 }
 0x3b4   : > { %v2265_v53 = vpop.f32.mrb[10].mxu1 }
 0x3b5   : > { %v1233_v54 = vpop.f32.mrb[11].mxu1 }
 0x3ba   : > { %v2268_v55 = vpop.f32.mrb[12].mxu1 }
 0x3bb   : > { %v1246_v56 = vpop.f32.mrb[13].mxu1 }
 0x3bc   : > { %v2269_v2 = vpop.f32.mrb[14].mxu1 }
 0x3bd   : > { %v1249_v57 = vpop.f32.mrb[15].mxu1 }
 0x3c3   : > { %v2324_v58 = vpop.f32.mrb[4].mxu0 }
 0x3c4   : > { %v2354_v60 = vadd.f32 %v2324_v58, %v2264_v51  ;;  %v1801_v61 = vpop.f32.mrb[5].mxu0 }
 0x3c5   : > { %v2355_v62 = vadd.f32 %v1801_v61, %v1230_v52  ;;  %v2325_v10 = vpop.f32.mrb[6].mxu0 }
 0x3c6   : > { %v1849_v63 = vadd.f32 %v2354_v60, %v2096_v59  ;;  %v2356_v11 = vadd.f32 %v2325_v10, %v2265_v53  ;;  %v1804_v0 = vpop.f32.mrb[7].mxu0 }
 0x3c7   : > { %v1847_v13 = vadd.f32 %v2355_v62, %v2096_v59  ;;  %v2357_v40 = vadd.f32 %v1804_v0, %v1233_v54 }
 0x3c8   : > { %1858 = vst.msk [vmem:[%s294_s24 + $0x10] sm:$0xff] %vm1855_vm3, %v1849_v63  ;;  %v1850_v39 = vadd.f32 %v2356_v11, %v2096_v59 }
 0x3c9   : > { %1856 = vst.msk [vmem:[%s294_s24] sm:$0xff] %vm1855_vm3, %v1847_v13  ;;  %v1848_v5 = vadd.f32 %v2357_v40, %v2096_v59 }
 0x3ca   : > { %1859 = vst.msk [vmem:[%s294_s24 + $0x18] sm:$0xff] %vm1855_vm3, %v1850_v39 }
 0x3cb   : > { %1857 = vst.msk [vmem:[%s294_s24 + $0x8] sm:$0xff] %vm1855_vm3, %v1848_v5  ;;  %v2328_v14 = vpop.f32.mrb[8].mxu0 }
 0x3cc   : > { %v2358_v6 = vadd.f32 %v2328_v14, %v2268_v55  ;;  %v1817_v19 = vpop.f32.mrb[9].mxu0 }
 0x3cd   : > { %v2359_v25 = vadd.f32 %v1817_v19, %v1246_v56  ;;  %v2329_v29 = vpop.f32.mrb[10].mxu0 }
 0x3ce   : > { %v1853_v30 = vadd.f32 %v2358_v6, %v2096_v59  ;;  %v2360_v15 = vadd.f32 %v2329_v29, %v2269_v2  ;;  %v1820_v16 = vpop.f32.mrb[11].mxu0 }
 0x3cf   : > { %v1851_v17 = vadd.f32 %v2359_v25, %v2096_v59  ;;  %v2361_v18 = vadd.f32 %v1820_v16, %v1249_v57 }
 0x3d0   : > { %1862 = vst.msk [vmem:[%s294_s24 + $0x30] sm:$0xff] %vm1855_vm3, %v1853_v30  ;;  %v1854_v20 = vadd.f32 %v2360_v15, %v2096_v59 }
 0x3d1   : > { %1860 = vst.msk [vmem:[%s294_s24 + $0x20] sm:$0xff] %vm1855_vm3, %v1851_v17  ;;  %v1852_v21 = vadd.f32 %v2361_v18, %v2096_v59 }
 0x3d2   : > { %1863 = vst.msk [vmem:[%s294_s24 + $0x38] sm:$0xff] %vm1855_vm3, %v1854_v20 }
 0x3d3   : > { %1861 = vst.msk [vmem:[%s294_s24 + $0x28] sm:$0xff] %vm1855_vm3, %v1852_v21 }
 0x3d4   : > { %2722 = shalt.err (!%p2719_p13)
}
 0x3d5   : > { %s2723_s15 = scalar_lea.hbm %s3425_s13, 1024  ;;  %s2727_s29 = scalar_lea.hbm %s3479_s5, 2048 }
 0x3d6   : > { %p2724_p0 = scmp.ne.s32.totalorder %s3425_s13, %s2723_s15  ;;  %p2728_p9 = scmp.lt.u32.totalorder %s3425_s13, %s3479_s5 }
 0x3d7   : > { %p2729_p12 = scmp.lt.u32.totalorder %s2727_s29, %s2723_s15  ;;  %p2731_p4 = scmp.lt.u32.totalorder %s2723_s15, %s3425_s13 }
 0x3d8   : > { %p2725_p5 = pnand %p2724_p0, %p2983_p1 }
 0x3d9   : > { %p2730_p2 = por %p2729_p12, %p2728_p9 }
 0x3da   : > { %p2726_p11 = pneg %p2725_p5 }
 0x3db   : > { %p2732_p6 = por %p2731_p4, %p2730_p2 }
 0x3dd   : > { %p2733_p8 = pnand %p2732_p6, %p2726_p11 }
 0x3df   : > { %2736 = shalt.err (!%p2733_p8)
}
 0x3e0   : > { %s2799_s26 = smov 128   ;;  %s2800_s12 = smov 8  }
 0x3e1   : > { %2436 = dma.vmem_to_hbm [thread:$0]  (%p2983_p1), %s3427_s10, 1024, %s3425_s13, %s1865_s22, %s2799_s26, %s2799_s26, %s2800_s12  }
 0x3e2 PF: > { %s1893_s8 = sand.u32 1, %s2771_s18   ;;  %p3509_p3 = scmp.ne.s32.totalorder %s3484_s25, 0 }
 0x3e3   : > { %p3510_p7 = scmp.ge.s32.totalorder %s2783_s21, 2  ;;  %s1894_s27 = scalar_lea.sflag [#allocation5], %s1893_s8 }
 0x3e5   : > { %p2456_p10 = pnand %p3510_p7, %p3509_p3 }
 0x3e7   : > { %2766 = dma.done.wait (!%p2456_p10), %s1894_s27, 1024  }
 0x3e8   : > { %2768 = vsyncadd (!%p2456_p10), %s1894_s27, 4294966272  ;;  %p20_p13 = scmp.ge.s32.totalorder %s2973_s14, 4   ;;  %s3511_s18 = smov %s2775_s19 }
 0x3e9   : > { %s3512_s19 = smov %s2779_s20  ;;  %s3513_s20 = smov %s2989_s17 }
 0x3ea   : > { %s3514_s21 = smov %s2973_s14  ;;  %22 = sbr.rel (!%p20_p13) target bundleno = 7 (0x7), region = 112 }
 0x3f1   :  { %1899 = vsyncpa [#allocation4], 1 }
 0x3f2   :  { %1901 = vsyncpa [#allocation4 + $0x1], 1 }
 0x3f3   :  { %1902 = vsyncpa [#allocation7], 1 }
 0x3f4   :  { %1903 = vsyncpa [#allocation10], 1 }
 0x3f5   :  { %1904 = vsyncpa [#allocation5], 1 }
 0x3f6   :  { %1906 = vsyncpa [#allocation5 + $0x1], 1 }

</bundles_post_ra>
